<compile_context>
chip_gen: v7x
topology: tpu7x:2x2x1
jax: 0.10.0
libtpu: 0.0.40
codegen_flags: <defaults>
</compile_context>

<pallas_src>
import functools

import jax
import jax.numpy as jnp
from jax.experimental import pallas as pl
from jax.experimental.pallas import tpu as pltpu


def _round_up(n, m):
    return ((n + m - 1) // m) * m


def _choose_tb(batch, block_b):
    """Batch tile: multiple of 128 lanes, <= block_b, >= 4 tiles if possible."""
    block_b = max(128, _round_up(block_b, 128))
    tb = max(128, _round_up(-(-batch // 4), 128))   # ~batch/4, 128-aligned
    return min(block_b, tb)


def _discriminator_kernel(xt_ref, w1_ref, b1_ref, w2_ref, b2_ref,
                          w3_ref, b3_ref, o_ref, xpad_ref):
    # ---- fc1 on the MXU ----------------------------------------------------
    # Contraction depth is 3; zero-pad it to 8 in a VMEM scratch so the matmul
    # sees an aligned K (x itself stays (3, B) in HBM: 12 B/row of traffic).
    xpad_ref[...] = jnp.zeros(xpad_ref.shape, xpad_ref.dtype)
    xpad_ref[0:3, :] = xt_ref[...]                            # (3, TB) real rows
    h1 = jnp.dot(w1_ref[...], xpad_ref[...],
                 preferred_element_type=jnp.float32)          # (512, TB) f32
    h1 = h1 + b1_ref[...]                                     # lane-broadcast bias
    h1 = jnp.maximum(h1, 0.2 * h1)                            # LeakyReLU(0.2)

    # ---- fc2 on the MXU (bf16 inputs, f32 accumulation) ---------------------
    h2 = jnp.dot(w2_ref[...], h1.astype(jnp.bfloat16),
                 preferred_element_type=jnp.float32)          # (256, TB) f32
    h2 = h2 + b2_ref[...]
    h2 = jnp.maximum(h2, 0.2 * h2)                            # LeakyReLU(0.2)

    # ---- fc3: broadcast multiply + sublane reduction -> lane-dense (1, TB) --
    h3 = jnp.sum(h2 * w3_ref[...], axis=0, keepdims=True) + b3_ref[...]

    # ---- numerically-stable sigmoid; reciprocal on the (idle) EUP slot ------
    ez = jnp.exp(-jnp.abs(h3))
    inv = pl.reciprocal(1.0 + ez, approx=True)
    o_ref[...] = jnp.where(h3 >= 0.0, inv, ez * inv)


@functools.partial(jax.jit, static_argnames=("block_b",))
def discriminator_forward(x, params, *, block_b=1024):
    """x: (B, 3) float32 -> (B, 1) float32."""
    w1t, b1, w2t, b2, w3c, b3 = params
    B = x.shape[0]

    TB = _choose_tb(B, block_b)
    B_pad = _round_up(B, TB)

    xt = x.T                                    # (3, B): batch on lanes everywhere
    if B_pad != B:
        xt = jnp.pad(xt, ((0, 0), (0, B_pad - B)))

    grid = (B_pad // TB,)
    const = lambda shape: pl.BlockSpec(shape, lambda i: (0, 0))  # VMEM-resident

    out = pl.pallas_call(
        _discriminator_kernel,
        out_shape=jax.ShapeDtypeStruct((1, B_pad), jnp.float32),
        grid=grid,
        in_specs=[
            pl.BlockSpec((3, TB), lambda i: (0, i)),   # x tile, batch on lanes
            const(w1t.shape), const(b1.shape),         # weights stay resident
            const(w2t.shape), const(b2.shape),
            const(w3c.shape), const(b3.shape),
        ],
        out_specs=pl.BlockSpec((1, TB), lambda i: (0, i)),   # lane-dense store
        scratch_shapes=[pltpu.VMEM((8, TB), jnp.float32)],   # K-padded x tile
        compiler_params=pltpu.CompilerParams(
            dimension_semantics=("parallel",),
            vmem_limit_bytes=32 * 1024 * 1024,
        ),
    )(xt, w1t, b1, w2t, b2, w3c, b3)

    return out[0, :B].reshape(B, 1)


def init_params(key):
    """Mimics PyTorch's default Linear init (uniform +/- 1/sqrt(fan_in)).
    Weights are stored [out, in] (PyTorch layout == the transposed layout the
    kernel wants).  w1 is zero-padded from K=3 to K=8; w2 stored bf16
    (MXU-native); biases as [out, 1] columns; b3 as (1, 1)."""
    k1w, k1b, k2w, k2b, k3w, k3b = jax.random.split(key, 6)

    def u(k, shape, fan_in):
        bound = 1.0 / (fan_in ** 0.5)
        return jax.random.uniform(k, shape, jnp.float32, -bound, bound)

    w1t = jnp.pad(u(k1w, (512, 3), 3), ((0, 0), (0, 5)))     # (512, 8), cols 3..7 = 0
    b1 = u(k1b, (512, 1), 3)
    w2t = u(k2w, (256, 512), 512).astype(jnp.bfloat16)       # (256, 512) bf16
    b2 = u(k2b, (256, 1), 512)
    w3c = u(k3w, (256, 1), 256)                              # (256, 1)
    b3 = u(k3b, (1, 1), 256)
    return (w1t, b1, w2t, b2, w3c, b3)


def _reference_forward(x, params, *, fc2_bf16=True):
    w1t, b1, w2t, b2, w3c, b3 = params
    hp = jax.lax.Precision.HIGHEST
    h = jnp.dot(x, w1t[:, :3].T, precision=hp) + b1[:, 0]
    h = jnp.maximum(h, 0.2 * h)
    if fc2_bf16:
        h = jnp.dot(h.astype(jnp.bfloat16), w2t.T,
                    preferred_element_type=jnp.float32) + b2[:, 0]
    else:
        h = jnp.dot(h, w2t.T.astype(jnp.float32), precision=hp) + b2[:, 0]
    h = jnp.maximum(h, 0.2 * h)
    h = jnp.dot(h, w3c, precision=hp) + b3[0, 0]
    return jax.nn.sigmoid(h)


if __name__ == "__main__":
    key = jax.random.PRNGKey(0)
    key, kx1, kx2 = jax.random.split(key, 3)
    params = init_params(key)

    # Small batch: single 128-wide tile (batch padded 8 -> 128).
    B = 8
    x = jax.random.normal(kx1, (B, 3), dtype=jnp.float32)
    out = jax.block_until_ready(discriminator_forward(x, params))
    ref = _reference_forward(x, params)
    ref_f32 = _reference_forward(x, params, fc2_bf16=False)
    assert out.shape == (B, 1), out.shape
    assert jnp.allclose(out, ref, atol=5e-3, rtol=5e-3), (out, ref)
    assert jnp.allclose(out, ref_f32, atol=3e-2), (out, ref_f32)  # bf16 fc2 sanity

    # Larger, non-multiple-of-tile batch: multi-tile grid (3 tiles) + padding.
    B2 = 300
    x2 = jax.random.normal(kx2, (B2, 3), dtype=jnp.float32)
    out2 = jax.block_until_ready(discriminator_forward(x2, params))
    ref2 = _reference_forward(x2, params)
    assert out2.shape == (B2, 1), out2.shape
    assert jnp.allclose(out2, ref2, atol=5e-3, rtol=5e-3), (out2, ref2)

    print("KERNEL_OK")
</pallas_src>

<mosaic_0001>
module attributes {stable_mosaic.version = 11 : i64} {
  func.func @_discriminator_kernel(%arg0: i32, %arg1: memref<3x128xf32, #tpu.memory_space<vmem>>, %arg2: memref<512x8xf32, #tpu.memory_space<vmem>>, %arg3: memref<512x1xf32, #tpu.memory_space<vmem>>, %arg4: memref<256x512xbf16, #tpu.memory_space<vmem>>, %arg5: memref<256x1xf32, #tpu.memory_space<vmem>>, %arg6: memref<256x1xf32, #tpu.memory_space<vmem>>, %arg7: memref<1x1xf32, #tpu.memory_space<vmem>>, %arg8: memref<1x128xf32, #tpu.memory_space<vmem>>, %arg9: memref<8x128xf32, #tpu.memory_space<vmem>>) attributes {dimension_semantics = [#tpu.dimension_semantics<parallel>], iteration_bounds = array<i64: 1>, scalar_prefetch = 0 : i64, scratch_operands = 1 : i64, tpu.core_type = #tpu.core_type<tc>, window_params = [{transform_indices = @transform_0, window_bounds = array<i64: 3, 128>}, {pipeline_mode = #tpu.pipeline_mode<synchronous>, transform_indices = @transform_1, window_bounds = array<i64: 512, 8>}, {pipeline_mode = #tpu.pipeline_mode<synchronous>, transform_indices = @transform_2, window_bounds = array<i64: 512, 1>}, {pipeline_mode = #tpu.pipeline_mode<synchronous>, transform_indices = @transform_3, window_bounds = array<i64: 256, 512>}, {pipeline_mode = #tpu.pipeline_mode<synchronous>, transform_indices = @transform_4, window_bounds = array<i64: 256, 1>}, {pipeline_mode = #tpu.pipeline_mode<synchronous>, transform_indices = @transform_5, window_bounds = array<i64: 256, 1>}, {pipeline_mode = #tpu.pipeline_mode<synchronous>, transform_indices = @transform_6, window_bounds = array<i64: 1, 1>}, {transform_indices = @transform_7, window_bounds = array<i64: 1, 128>}]} {
    %cst = arith.constant 0.000000e+00 : f32
    %0 = vector.broadcast %cst : f32 to vector<8x128xf32>
    %c0 = arith.constant 0 : index
    %c0_0 = arith.constant 0 : index
    %1 = vector.load %arg9[%c0, %c0_0] : memref<8x128xf32, #tpu.memory_space<vmem>>, vector<8x128xf32>
    tpu.vector_store %arg9[%c0, %c0_0], %0 {strides = array<i32>} : memref<8x128xf32, #tpu.memory_space<vmem>>, vector<8x128xf32>,
    %c0_1 = arith.constant 0 : index
    %c0_2 = arith.constant 0 : index
    %2 = vector.load %arg1[%c0_1, %c0_2] : memref<3x128xf32, #tpu.memory_space<vmem>>, vector<3x128xf32>
    %c0_3 = arith.constant 0 : index
    %c0_4 = arith.constant 0 : index
    %3 = vector.load %arg9[%c0_3, %c0_4] : memref<8x128xf32, #tpu.memory_space<vmem>>, vector<3x128xf32>
    tpu.vector_store %arg9[%c0_3, %c0_4], %2 {strides = array<i32>} : memref<8x128xf32, #tpu.memory_space<vmem>>, vector<3x128xf32>,
    %c0_5 = arith.constant 0 : index
    %c0_6 = arith.constant 0 : index
    %4 = vector.load %arg2[%c0_5, %c0_6] : memref<512x8xf32, #tpu.memory_space<vmem>>, vector<512x8xf32>
    %c0_7 = arith.constant 0 : index
    %c0_8 = arith.constant 0 : index
    %5 = vector.load %arg9[%c0_7, %c0_8] : memref<8x128xf32, #tpu.memory_space<vmem>>, vector<8x128xf32>
    %cst_9 = arith.constant dense<0.000000e+00> : vector<512x128xf32>
    %6 = tpu.matmul %4, %5, %cst_9 {dimension_numbers = #tpu.dot_dimension_numbers<[1], [0], [0], [1], [0, 0, 1, 1], [], []>} : vector<512x8xf32>, vector<8x128xf32>, vector<512x128xf32> -> vector<512x128xf32>
    %c0_10 = arith.constant 0 : index
    %c0_11 = arith.constant 0 : index
    %7 = vector.load %arg3[%c0_10, %c0_11] : memref<512x1xf32, #tpu.memory_space<vmem>>, vector<512x1xf32>
    %8 = vector.broadcast %7 : vector<512x1xf32> to vector<512x128xf32>
    %9 = arith.addf %6, %8 : vector<512x128xf32>
    %cst_12 = arith.constant 2.000000e-01 : f32
    %10 = vector.broadcast %cst_12 : f32 to vector<512x128xf32>
    %11 = arith.mulf %10, %9 : vector<512x128xf32>
    %12 = arith.maximumf %9, %11 : vector<512x128xf32>
    %c0_13 = arith.constant 0 : index
    %c0_14 = arith.constant 0 : index
    %13 = vector.load %arg4[%c0_13, %c0_14] : memref<256x512xbf16, #tpu.memory_space<vmem>>, vector<256x512xbf16>
    %14 = arith.truncf %12 : vector<512x128xf32> to vector<512x128xbf16>
    %cst_15 = arith.constant dense<0.000000e+00> : vector<256x128xf32>
    %15 = tpu.matmul %13, %14, %cst_15 {dimension_numbers = #tpu.dot_dimension_numbers<[1], [0], [0], [1], [0, 0, 1, 1], [], []>} : vector<256x512xbf16>, vector<512x128xbf16>, vector<256x128xf32> -> vector<256x128xf32>
    %c0_16 = arith.constant 0 : index
    %c0_17 = arith.constant 0 : index
    %16 = vector.load %arg5[%c0_16, %c0_17] : memref<256x1xf32, #tpu.memory_space<vmem>>, vector<256x1xf32>
    %17 = vector.broadcast %16 : vector<256x1xf32> to vector<256x128xf32>
    %18 = arith.addf %15, %17 : vector<256x128xf32>
    %cst_18 = arith.constant 2.000000e-01 : f32
    %19 = vector.broadcast %cst_18 : f32 to vector<256x128xf32>
    %20 = arith.mulf %19, %18 : vector<256x128xf32>
    %21 = arith.maximumf %18, %20 : vector<256x128xf32>
    %c0_19 = arith.constant 0 : index
    %c0_20 = arith.constant 0 : index
    %22 = vector.load %arg6[%c0_19, %c0_20] : memref<256x1xf32, #tpu.memory_space<vmem>>, vector<256x1xf32>
    %23 = vector.broadcast %22 : vector<256x1xf32> to vector<256x128xf32>
    %24 = arith.mulf %21, %23 : vector<256x128xf32>
    %cst_21 = arith.constant dense<0.000000e+00> : vector<128xf32>
    %25 = vector.multi_reduction <add>, %24, %cst_21 [0] : vector<256x128xf32> to vector<128xf32>
    %26 = vector.shape_cast %25 : vector<128xf32> to vector<1x128xf32>
    %c0_22 = arith.constant 0 : index
    %c0_23 = arith.constant 0 : index
    %27 = vector.load %arg7[%c0_22, %c0_23] : memref<1x1xf32, #tpu.memory_space<vmem>>, vector<1x1xf32>
    %28 = vector.broadcast %27 : vector<1x1xf32> to vector<1x128xf32>
    %29 = arith.addf %26, %28 : vector<1x128xf32>
    %30 = math.absf %29 : vector<1x128xf32>
    %cst_24 = arith.constant 0.000000e+00 : f32
    %31 = vector.broadcast %cst_24 : f32 to vector<1x128xf32>
    %32 = arith.subf %31, %30 : vector<1x128xf32>
    %33 = math.exp %32 : vector<1x128xf32>
    %cst_25 = arith.constant 1.000000e+00 : f32
    %34 = vector.broadcast %cst_25 : f32 to vector<1x128xf32>
    %35 = arith.addf %34, %33 : vector<1x128xf32>
    %36 = tpu.reciprocal %35 {approx = true} : vector<1x128xf32> -> vector<1x128xf32>
    %cst_26 = arith.constant 0.000000e+00 : f32
    %37 = vector.broadcast %cst_26 : f32 to vector<1x128xf32>
    %38 = arith.cmpf oge, %29, %37 : vector<1x128xf32>
    %39 = arith.mulf %33, %36 : vector<1x128xf32>
    %40 = arith.select %38, %36, %39 : vector<1x128xi1>, vector<1x128xf32>
    %c0_27 = arith.constant 0 : index
    %c0_28 = arith.constant 0 : index
    %41 = vector.load %arg8[%c0_27, %c0_28] : memref<1x128xf32, #tpu.memory_space<vmem>>, vector<1x128xf32>
    tpu.vector_store %arg8[%c0_27, %c0_28], %40 {strides = array<i32>} : memref<1x128xf32, #tpu.memory_space<vmem>>, vector<1x128xf32>,
    return
  }
  func.func @transform_0(%arg0: i32) -> (i32, i32) {
    %c0_i32 = arith.constant 0 : i32
    %c0_i32_0 = arith.constant 0 : i32
    return %c0_i32, %arg0 : i32, i32
  }
  func.func @transform_1(%arg0: i32) -> (i32, i32) {
    %c0_i32 = arith.constant 0 : i32
    %c0_i32_0 = arith.constant 0 : i32
    %c0_i32_1 = arith.constant 0 : i32
    return %c0_i32, %c0_i32_0 : i32, i32
  }
  func.func @transform_2(%arg0: i32) -> (i32, i32) {
    %c0_i32 = arith.constant 0 : i32
    %c0_i32_0 = arith.constant 0 : i32
    %c0_i32_1 = arith.constant 0 : i32
    return %c0_i32, %c0_i32_0 : i32, i32
  }
  func.func @transform_3(%arg0: i32) -> (i32, i32) {
    %c0_i32 = arith.constant 0 : i32
    %c0_i32_0 = arith.constant 0 : i32
    %c0_i32_1 = arith.constant 0 : i32
    return %c0_i32, %c0_i32_0 : i32, i32
  }
  func.func @transform_4(%arg0: i32) -> (i32, i32) {
    %c0_i32 = arith.constant 0 : i32
    %c0_i32_0 = arith.constant 0 : i32
    %c0_i32_1 = arith.constant 0 : i32
    return %c0_i32, %c0_i32_0 : i32, i32
  }
  func.func @transform_5(%arg0: i32) -> (i32, i32) {
    %c0_i32 = arith.constant 0 : i32
    %c0_i32_0 = arith.constant 0 : i32
    %c0_i32_1 = arith.constant 0 : i32
    return %c0_i32, %c0_i32_0 : i32, i32
  }
  func.func @transform_6(%arg0: i32) -> (i32, i32) {
    %c0_i32 = arith.constant 0 : i32
    %c0_i32_0 = arith.constant 0 : i32
    %c0_i32_1 = arith.constant 0 : i32
    return %c0_i32, %c0_i32_0 : i32, i32
  }
  func.func @transform_7(%arg0: i32) -> (i32, i32) {
    %c0_i32 = arith.constant 0 : i32
    %c0_i32_0 = arith.constant 0 : i32
    return %c0_i32, %arg0 : i32, i32
  }
}

</mosaic_0001>

<bundles_post_ra>
// kernel: discriminator_forward.1
= control target key start
LH: loop header
LB: loop body
LE: loop exit
PB: predicated region body
PF: predicated region fallthrough
CT: control target
= control target key end

     0   :  { %v3088_v0 = vmov 0   ;;  %v3089_v3 = vmov 0.0   ;;  %vm481_vm0 = vcmask 64512   ;;  %s4346_s2 = inlined_call_operand.vmem [shape: f32[512,1], index: 2, kind: input, shape index: {}]   ;;  %s4347_s0 = inlined_call_operand.vmem [shape: f32[3,128], index: 0, kind: input, shape index: {}]   ;;  %s4348_s1 = inlined_call_operand.vmem [shape: f32[512,8], index: 1, kind: input, shape index: {}]   ;;  %s4349_s6 = inlined_call_operand.<no memory space> [shape: f32[1,1], index: 6, kind: input, shape index: {}]   ;;  %s4350_s4 = inlined_call_operand.vmem [shape: f32[256,1], index: 4, kind: input, shape index: {}]   ;;  %s4351_s5 = inlined_call_operand.vmem [shape: f32[256,1], index: 5, kind: input, shape index: {}]   ;;  %s4352_s3 = inlined_call_operand.vmem [shape: bf16[256,512], index: 3, kind: input, shape index: {}]   ;;  %s4353_s7 = inlined_call_operand.vmem [shape: f32[1,128], index: 7, kind: output, shape index: {}]  }
   0x1   :  { %2987 = vset.pattern.permute.xlu1 %v3088_v0  ;;  %2986 = vset.pattern.permute.xlu0 %v3088_v0  ;;  %v99_v1 = vld [vmem:[%s4346_s2 + $0x10] sm:$0xff]  ;;  %v97_v2 = vld [vmem:[%s4346_s2] sm:$0xff]  ;;  %29 = vst [vmem:[#allocation2] sm:$0xff] %v3089_v3  ;;  %v100_v4 = vld [vmem:[%s4346_s2 + $0x18] sm:$0xff] }
   0x2   :  { %173 = vperm.xlu1 %2987, %v99_v1   ;;  %163 = vperm.xlu0 %2986, %v97_v2   ;;  %v98_v5 = vld [vmem:[%s4346_s2 + $0x8] sm:$0xff]  ;;  %v30_v6 = vld [vmem:[%s4347_s0] sm:$0x7]  ;;  %v34_v16 = vld [vmem:[%s4348_s1 + $0x10] sm:$0xff] }
   0x3   :  { %v32_v7 = vld [vmem:[%s4348_s1] sm:$0xff]  ;;  %31 = vst [vmem:[#allocation2] sm:$0x7] %v30_v6  ;;  %v114_v9 = vld [vmem:[%s4346_s2 + $0x88] sm:$0xff]  ;;  %v66_v17 = vld [vmem:[%s4348_s1 + $0x110] sm:$0xff] }
   0x4   :  { %v64_v8 = vld [vmem:[%s4348_s1 + $0x100] sm:$0xff]  ;;  %2886 = vmatprep.mubr.msk.f32.mxu0 %vm481_vm0, %v32_v7  ;;  %v33_v12 = vld [vmem:[%s4348_s1 + $0x8] sm:$0xff]  ;;  %v35_v18 = vld [vmem:[%s4348_s1 + $0x18] sm:$0xff] }
   0x5   :  { %2934 = vmatprep.mubr.msk.f32.mxu1 %vm481_vm0, %v64_v8  ;;  %v113_v10 = vld [vmem:[%s4346_s2 + $0x80] sm:$0xff]  ;;  %v65_v13 = vld [vmem:[%s4348_s1 + $0x108] sm:$0xff]  ;;  %v67_v19 = vld [vmem:[%s4348_s1 + $0x118] sm:$0xff] }
   0x6   :  { %178 = vperm.xlu1 %2987, %v100_v4   ;;  %168 = vperm.xlu0 %2986, %v98_v5   ;;  %v146_v14 = vld [vmem:[%s4346_s2 + $0x188] sm:$0xff]  ;;  %v145_v15 = vld [vmem:[%s4346_s2 + $0x180] sm:$0xff]  ;;  %v116_v26 = vld [vmem:[%s4346_s2 + $0x98] sm:$0xff] }
   0x7   :  { %v130_v20 = vld [vmem:[%s4346_s2 + $0x108] sm:$0xff]  ;;  %v129_v21 = vld [vmem:[%s4346_s2 + $0x100] sm:$0xff]  ;;  %v115_v27 = vld [vmem:[%s4346_s2 + $0x90] sm:$0xff] }
   0x8   :  { %v36_v22 = vld [vmem:[%s4348_s1 + $0x20] sm:$0xff]  ;;  %v37_v24 = vld [vmem:[%s4348_s1 + $0x28] sm:$0xff]  ;;  %v38_v28 = vld [vmem:[%s4348_s1 + $0x30] sm:$0xff] }
   0x9   :  { %v68_v23 = vld [vmem:[%s4348_s1 + $0x120] sm:$0xff]  ;;  %v69_v25 = vld [vmem:[%s4348_s1 + $0x128] sm:$0xff]  ;;  %v70_v29 = vld [vmem:[%s4348_s1 + $0x130] sm:$0xff] }
   0xa   :  { %248 = vperm.xlu1 %2987, %v114_v9   ;;  %243 = vperm.xlu0 %2986, %v113_v10   ;;  %v96_v11 = vld [vmem:[#allocation2] sm:$0xff]  ;;  %v39_v30 = vld [vmem:[%s4348_s1 + $0x38] sm:$0xff]  ;;  %v147_v33 = vld [vmem:[%s4346_s2 + $0x190] sm:$0xff] }
   0xb   :  { %2884 = vmatprep.subr.mxu0 %v96_v11  ;;  %2982 = vmatprep.subr.mxu1 %v96_v11  ;;  %v71_v31 = vld [vmem:[%s4348_s1 + $0x138] sm:$0xff]  ;;  %v40_v34 = vld [vmem:[%s4348_s1 + $0x40] sm:$0xff]  ;;  %v41_v36 = vld [vmem:[%s4348_s1 + $0x48] sm:$0xff] }
   0xc   :  { %2885 = vmatpush3.msra.mxu0 %v96_v11  ;;  %2983 = vmatpush3.msra.mxu1 %v96_v11  ;;  %v148_v32 = vld [vmem:[%s4346_s2 + $0x198] sm:$0xff]  ;;  %v72_v35 = vld [vmem:[%s4348_s1 + $0x140] sm:$0xff]  ;;  %v73_v37 = vld [vmem:[%s4348_s1 + $0x148] sm:$0xff] }
   0xd   :  { %2887 = vmatmul.mubr.msk.f32.vlgmr.msra.gmra.mrb[0].mxu0 %vm481_vm0, %v33_v12  ;;  %2935 = vmatmul.mubr.msk.f32.vlgmr.msra.gmra.mrb[0].mxu1 %vm481_vm0, %v65_v13  ;;  %v132_v38 = vld [vmem:[%s4346_s2 + $0x118] sm:$0xff]  ;;  %v131_v39 = vld [vmem:[%s4346_s2 + $0x110] sm:$0xff]  ;;  %v118_v44 = vld [vmem:[%s4346_s2 + $0xa8] sm:$0xff] }
   0xe   :  { %408 = vperm.xlu1 %2987, %v146_v14   ;;  %403 = vperm.xlu0 %2986, %v145_v15   ;;  %v42_v40 = vld [vmem:[%s4348_s1 + $0x50] sm:$0xff]  ;;  %v43_v42 = vld [vmem:[%s4348_s1 + $0x58] sm:$0xff]  ;;  %v117_v45 = vld [vmem:[%s4346_s2 + $0xa0] sm:$0xff] }
   0xf   :  { %2889 = vmatprep.mubr.msk.f32.mxu0 %vm481_vm0, %v34_v16  ;;  %2937 = vmatprep.mubr.msk.f32.mxu1 %vm481_vm0, %v66_v17  ;;  %v74_v41 = vld [vmem:[%s4348_s1 + $0x150] sm:$0xff]  ;;  %v75_v43 = vld [vmem:[%s4348_s1 + $0x158] sm:$0xff]  ;;  %v44_v46 = vld [vmem:[%s4348_s1 + $0x60] sm:$0xff] }
  0x10   :  { %v76_v47 = vld [vmem:[%s4348_s1 + $0x160] sm:$0xff]  ;;  %v45_v48 = vld [vmem:[%s4348_s1 + $0x68] sm:$0xff]  ;;  %v46_v52 = vld [vmem:[%s4348_s1 + $0x70] sm:$0xff] }
  0x11   :  { %2890 = vmatmul.mubr.msk.f32.gmra.mrb[2].mxu0 %vm481_vm0, %v35_v18  ;;  %2938 = vmatmul.mubr.msk.f32.gmra.mrb[2].mxu1 %vm481_vm0, %v67_v19  ;;  %v77_v49 = vld [vmem:[%s4348_s1 + $0x168] sm:$0xff]  ;;  %v101_v51 = vld [vmem:[%s4346_s2 + $0x20] sm:$0xff]  ;;  %v78_v53 = vld [vmem:[%s4348_s1 + $0x170] sm:$0xff] }
  0x12   :  { %328 = vperm.xlu1 %2987, %v130_v20   ;;  %323 = vperm.xlu0 %2986, %v129_v21   ;;  %v102_v50 = vld [vmem:[%s4346_s2 + $0x28] sm:$0xff]  ;;  %v47_v54 = vld [vmem:[%s4348_s1 + $0x78] sm:$0xff]  ;;  %v149_v57 = vld [vmem:[%s4346_s2 + $0x1a0] sm:$0xff] }
  0x13   :  { %2892 = vmatprep.mubr.msk.f32.mxu0 %vm481_vm0, %v36_v22  ;;  %2940 = vmatprep.mubr.msk.f32.mxu1 %vm481_vm0, %v68_v23  ;;  %v79_v55 = vld [vmem:[%s4348_s1 + $0x178] sm:$0xff]  ;;  %v150_v56 = vld [vmem:[%s4346_s2 + $0x1a8] sm:$0xff]  ;;  %v48_v58 = vld [vmem:[%s4348_s1 + $0x80] sm:$0xff] }
  0x14   :  { %v80_v59 = vld [vmem:[%s4348_s1 + $0x180] sm:$0xff]  ;;  %v49_v60 = vld [vmem:[%s4348_s1 + $0x88] sm:$0xff]  ;;  %v50_v0 = vld [vmem:[%s4348_s1 + $0x90] sm:$0xff] }
  0x15   :  { %2893 = vmatmul.mubr.msk.f32.gmra.mrb[4].mxu0 %vm481_vm0, %v37_v24  ;;  %2941 = vmatmul.mubr.msk.f32.gmra.mrb[4].mxu1 %vm481_vm0, %v69_v25  ;;  %v81_v61 = vld [vmem:[%s4348_s1 + $0x188] sm:$0xff]  ;;  %v133_v63 = vld [vmem:[%s4346_s2 + $0x120] sm:$0xff]  ;;  %v82_v1 = vld [vmem:[%s4348_s1 + $0x190] sm:$0xff] }
  0x16   :  { %258 = vperm.xlu1 %2987, %v116_v26   ;;  %253 = vperm.xlu0 %2986, %v115_v27   ;;  %v134_v62 = vld [vmem:[%s4346_s2 + $0x128] sm:$0xff]  ;;  %v51_v2 = vld [vmem:[%s4348_s1 + $0x98] sm:$0xff]  ;;  %v119_v5 = vld [vmem:[%s4346_s2 + $0xb0] sm:$0xff] }
  0x17   :  { %2895 = vmatprep.mubr.msk.f32.mxu0 %vm481_vm0, %v38_v28  ;;  %2943 = vmatprep.mubr.msk.f32.mxu1 %vm481_vm0, %v70_v29  ;;  %v83_v3 = vld [vmem:[%s4348_s1 + $0x198] sm:$0xff]  ;;  %v52_v6 = vld [vmem:[%s4348_s1 + $0xa0] sm:$0xff]  ;;  %v53_v8 = vld [vmem:[%s4348_s1 + $0xa8] sm:$0xff] }
  0x18   :  { %v120_v4 = vld [vmem:[%s4346_s2 + $0xb8] sm:$0xff]  ;;  %v84_v7 = vld [vmem:[%s4348_s1 + $0x1a0] sm:$0xff]  ;;  %v85_v9 = vld [vmem:[%s4348_s1 + $0x1a8] sm:$0xff] }
  0x19   :  { %2896 = vmatmul.mubr.msk.f32.gmra.mrb[6].mxu0 %vm481_vm0, %v39_v30  ;;  %2944 = vmatmul.mubr.msk.f32.gmra.mrb[6].mxu1 %vm481_vm0, %v71_v31  ;;  %v104_v10 = vld [vmem:[%s4346_s2 + $0x38] sm:$0xff]  ;;  %v103_v11 = vld [vmem:[%s4346_s2 + $0x30] sm:$0xff]  ;;  %v56_v18 = vld [vmem:[%s4348_s1 + $0xc0] sm:$0xff] }
  0x1a   :  { %418 = vperm.xlu1 %2987, %v148_v32   ;;  %413 = vperm.xlu0 %2986, %v147_v33   ;;  %v54_v12 = vld [vmem:[%s4348_s1 + $0xb0] sm:$0xff]  ;;  %v55_v14 = vld [vmem:[%s4348_s1 + $0xb8] sm:$0xff]  ;;  %v88_v19 = vld [vmem:[%s4348_s1 + $0x1c0] sm:$0xff] }
  0x1b   :  { %2898 = vmatprep.mubr.msk.f32.mxu0 %vm481_vm0, %v40_v34  ;;  %2946 = vmatprep.mubr.msk.f32.mxu1 %vm481_vm0, %v72_v35  ;;  %v86_v13 = vld [vmem:[%s4348_s1 + $0x1b0] sm:$0xff]  ;;  %v87_v15 = vld [vmem:[%s4348_s1 + $0x1b8] sm:$0xff]  ;;  %v57_v20 = vld [vmem:[%s4348_s1 + $0xc8] sm:$0xff] }
  0x1c   :  { %v152_v16 = vld [vmem:[%s4346_s2 + $0x1b8] sm:$0xff]  ;;  %v151_v17 = vld [vmem:[%s4346_s2 + $0x1b0] sm:$0xff]  ;;  %v89_v21 = vld [vmem:[%s4348_s1 + $0x1c8] sm:$0xff] }
  0x1d   :  { %2899 = vmatmul.mubr.msk.f32.gmra.mrb[8].mxu0 %vm481_vm0, %v41_v36  ;;  %2947 = vmatmul.mubr.msk.f32.gmra.mrb[8].mxu1 %vm481_vm0, %v73_v37  ;;  %v136_v22 = vld [vmem:[%s4346_s2 + $0x138] sm:$0xff]  ;;  %v135_v23 = vld [vmem:[%s4346_s2 + $0x130] sm:$0xff]  ;;  %v122_v28 = vld [vmem:[%s4346_s2 + $0xc8] sm:$0xff] }
  0x1e   :  { %338 = vperm.xlu1 %2987, %v132_v38   ;;  %333 = vperm.xlu0 %2986, %v131_v39   ;;  %v58_v24 = vld [vmem:[%s4348_s1 + $0xd0] sm:$0xff]  ;;  %v59_v26 = vld [vmem:[%s4348_s1 + $0xd8] sm:$0xff]  ;;  %v121_v29 = vld [vmem:[%s4346_s2 + $0xc0] sm:$0xff] }
  0x1f   :  { %2901 = vmatprep.mubr.msk.f32.mxu0 %vm481_vm0, %v42_v40  ;;  %2949 = vmatprep.mubr.msk.f32.mxu1 %vm481_vm0, %v74_v41  ;;  %v90_v25 = vld [vmem:[%s4348_s1 + $0x1d0] sm:$0xff]  ;;  %v91_v27 = vld [vmem:[%s4348_s1 + $0x1d8] sm:$0xff]  ;;  %v60_v30 = vld [vmem:[%s4348_s1 + $0xe0] sm:$0xff] }
  0x20   :  { %v92_v31 = vld [vmem:[%s4348_s1 + $0x1e0] sm:$0xff]  ;;  %v61_v32 = vld [vmem:[%s4348_s1 + $0xe8] sm:$0xff]  ;;  %v62_v36 = vld [vmem:[%s4348_s1 + $0xf0] sm:$0xff] }
  0x21   :  { %2902 = vmatmul.mubr.msk.f32.gmra.mrb[10].mxu0 %vm481_vm0, %v43_v42  ;;  %2950 = vmatmul.mubr.msk.f32.gmra.mrb[10].mxu1 %vm481_vm0, %v75_v43  ;;  %v93_v33 = vld [vmem:[%s4348_s1 + $0x1e8] sm:$0xff]  ;;  %v105_v35 = vld [vmem:[%s4346_s2 + $0x40] sm:$0xff]  ;;  %v94_v37 = vld [vmem:[%s4348_s1 + $0x1f0] sm:$0xff] }
  0x22   :  { %268 = vperm.xlu1 %2987, %v118_v44   ;;  %263 = vperm.xlu0 %2986, %v117_v45   ;;  %v106_v34 = vld [vmem:[%s4346_s2 + $0x48] sm:$0xff]  ;;  %v63_v38 = vld [vmem:[%s4348_s1 + $0xf8] sm:$0xff]  ;;  %v153_v41 = vld [vmem:[%s4346_s2 + $0x1c0] sm:$0xff] }
  0x23   :  { %2904 = vmatprep.mubr.msk.f32.mxu0 %vm481_vm0, %v44_v46  ;;  %2952 = vmatprep.mubr.msk.f32.mxu1 %vm481_vm0, %v76_v47  ;;  %v95_v39 = vld [vmem:[%s4348_s1 + $0x1f8] sm:$0xff]  ;;  %v154_v40 = vld [vmem:[%s4346_s2 + $0x1c8] sm:$0xff]  ;;  %v137_v43 = vld [vmem:[%s4346_s2 + $0x140] sm:$0xff] }
  0x24   :  { %v138_v42 = vld [vmem:[%s4346_s2 + $0x148] sm:$0xff]  ;;  %v124_v44 = vld [vmem:[%s4346_s2 + $0xd8] sm:$0xff]  ;;  %v123_v45 = vld [vmem:[%s4346_s2 + $0xd0] sm:$0xff] }
  0x25   :  { %2905 = vmatmul.mubr.msk.f32.gmra.mrb[12].mxu0 %vm481_vm0, %v45_v48  ;;  %2953 = vmatmul.mubr.msk.f32.gmra.mrb[12].mxu1 %vm481_vm0, %v77_v49  ;;  %v108_v46 = vld [vmem:[%s4346_s2 + $0x58] sm:$0xff]  ;;  %v107_v47 = vld [vmem:[%s4346_s2 + $0x50] sm:$0xff] }
  0x26   :  { %188 = vperm.xlu1 %2987, %v102_v50   ;;  %183 = vperm.xlu0 %2986, %v101_v51   ;;  %v156_v48 = vld [vmem:[%s4346_s2 + $0x1d8] sm:$0xff]  ;;  %v155_v49 = vld [vmem:[%s4346_s2 + $0x1d0] sm:$0xff] }
  0x27   :  { %2907 = vmatprep.mubr.msk.f32.mxu0 %vm481_vm0, %v46_v52  ;;  %2955 = vmatprep.mubr.msk.f32.mxu1 %vm481_vm0, %v78_v53  ;;  %v140_v50 = vld [vmem:[%s4346_s2 + $0x158] sm:$0xff]  ;;  %v139_v51 = vld [vmem:[%s4346_s2 + $0x150] sm:$0xff]  ;;  %v126_v52 = vld [vmem:[%s4346_s2 + $0xe8] sm:$0xff] }
  0x28   :  { %v125_v53 = vld [vmem:[%s4346_s2 + $0xe0] sm:$0xff] }
  0x29   :  { %2908 = vmatmul.mubr.msk.f32.gmra.mrb[14].mxu0 %vm481_vm0, %v47_v54  ;;  %2956 = vmatmul.mubr.msk.f32.gmra.mrb[14].mxu1 %vm481_vm0, %v79_v55  ;;  %v110_v54 = vld [vmem:[%s4346_s2 + $0x68] sm:$0xff]  ;;  %v109_v55 = vld [vmem:[%s4346_s2 + $0x60] sm:$0xff] }
  0x2a   :  { %428 = vperm.xlu1 %2987, %v150_v56   ;;  %423 = vperm.xlu0 %2986, %v149_v57   ;;  %v158_v56 = vld [vmem:[%s4346_s2 + $0x1e8] sm:$0xff]  ;;  %v157_v57 = vld [vmem:[%s4346_s2 + $0x1e0] sm:$0xff] }
  0x2b   :  { %2910 = vmatprep.mubr.msk.f32.mxu0 %vm481_vm0, %v48_v58  ;;  %2958 = vmatprep.mubr.msk.f32.mxu1 %vm481_vm0, %v80_v59  ;;  %v142_v58 = vld [vmem:[%s4346_s2 + $0x168] sm:$0xff]  ;;  %v141_v59 = vld [vmem:[%s4346_s2 + $0x160] sm:$0xff] }
  0x2d   :  { %2911 = vmatmul.mubr.msk.f32.gmra.mrb[16].mxu0 %vm481_vm0, %v49_v60  ;;  %2959 = vmatmul.mubr.msk.f32.gmra.mrb[16].mxu1 %vm481_vm0, %v81_v61  ;;  %v128_v60 = vld [vmem:[%s4346_s2 + $0xf8] sm:$0xff]  ;;  %v127_v61 = vld [vmem:[%s4346_s2 + $0xf0] sm:$0xff] }
  0x2e   :  { %348 = vperm.xlu1 %2987, %v134_v62   ;;  %343 = vperm.xlu0 %2986, %v133_v63   ;;  %v112_v62 = vld [vmem:[%s4346_s2 + $0x78] sm:$0xff]  ;;  %v111_v63 = vld [vmem:[%s4346_s2 + $0x70] sm:$0xff] }
  0x2f   :  { %2913 = vmatprep.mubr.msk.f32.mxu0 %vm481_vm0, %v50_v0  ;;  %2961 = vmatprep.mubr.msk.f32.mxu1 %vm481_vm0, %v82_v1  ;;  %v160_v0 = vld [vmem:[%s4346_s2 + $0x1f8] sm:$0xff]  ;;  %v159_v1 = vld [vmem:[%s4346_s2 + $0x1f0] sm:$0xff] }
  0x31   :  { %2914 = vmatmul.mubr.msk.f32.gmra.mrb[18].mxu0 %vm481_vm0, %v51_v2  ;;  %2962 = vmatmul.mubr.msk.f32.gmra.mrb[18].mxu1 %vm481_vm0, %v83_v3  ;;  %v144_v2 = vld [vmem:[%s4346_s2 + $0x178] sm:$0xff]  ;;  %v143_v3 = vld [vmem:[%s4346_s2 + $0x170] sm:$0xff] }
  0x32   :  { %278 = vperm.xlu1 %2987, %v120_v4   ;;  %273 = vperm.xlu0 %2986, %v119_v5   ;;  %v12_v4 = vstv %s4349_s6  ;;  %v1284_v5 = vld [vmem:[%s4350_s4 + $0x8] sm:$0xff] }
  0x33   :  { %2916 = vmatprep.mubr.msk.f32.mxu0 %vm481_vm0, %v52_v6  ;;  %2964 = vmatprep.mubr.msk.f32.mxu1 %vm481_vm0, %v84_v7  ;;  %13 = vst [vmem:[#allocation3] sm:$0x1] %v12_v4  ;;  %v1283_v6 = vld [vmem:[%s4350_s4] sm:$0xff]  ;;  %v2190_v4 = vld [vmem:[%s4351_s5 + $0x48] sm:$0xff] }
  0x35   :  { %2917 = vmatmul.mubr.msk.f32.gmra.mrb[20].mxu0 %vm481_vm0, %v53_v8  ;;  %2965 = vmatmul.mubr.msk.f32.gmra.mrb[20].mxu1 %vm481_vm0, %v85_v9  ;;  %v1286_v9 = vld [vmem:[%s4350_s4 + $0x18] sm:$0xff] }
  0x36   :  { %198 = vperm.xlu1 %2987, %v104_v10   ;;  %193 = vperm.xlu0 %2986, %v103_v11   ;;  %v1285_v10 = vld [vmem:[%s4350_s4 + $0x10] sm:$0xff] }
  0x37   :  { %2919 = vmatprep.mubr.msk.f32.mxu0 %vm481_vm0, %v54_v12  ;;  %2967 = vmatprep.mubr.msk.f32.mxu1 %vm481_vm0, %v86_v13  ;;  %v1288_v13 = vld [vmem:[%s4350_s4 + $0x28] sm:$0xff] }
  0x39   :  { %2920 = vmatmul.mubr.msk.f32.gmra.mrb[22].mxu0 %vm481_vm0, %v55_v14  ;;  %2968 = vmatmul.mubr.msk.f32.gmra.mrb[22].mxu1 %vm481_vm0, %v87_v15  ;;  %v1287_v14 = vld [vmem:[%s4350_s4 + $0x20] sm:$0xff] }
  0x3a   :  { %438 = vperm.xlu1 %2987, %v152_v16   ;;  %433 = vperm.xlu0 %2986, %v151_v17   ;;  %v1290_v17 = vld [vmem:[%s4350_s4 + $0x38] sm:$0xff] }
  0x3b   :  { %2922 = vmatprep.mubr.msk.f32.mxu0 %vm481_vm0, %v56_v18  ;;  %2970 = vmatprep.mubr.msk.f32.mxu1 %vm481_vm0, %v88_v19  ;;  %v1289_v18 = vld [vmem:[%s4350_s4 + $0x30] sm:$0xff] }
  0x3d   :  { %2923 = vmatmul.mubr.msk.f32.gmra.mrb[24].mxu0 %vm481_vm0, %v57_v20  ;;  %2971 = vmatmul.mubr.msk.f32.gmra.mrb[24].mxu1 %vm481_vm0, %v89_v21  ;;  %v1292_v21 = vld [vmem:[%s4350_s4 + $0x48] sm:$0xff] }
  0x3e   :  { %358 = vperm.xlu1 %2987, %v136_v22   ;;  %353 = vperm.xlu0 %2986, %v135_v23   ;;  %v1291_v22 = vld [vmem:[%s4350_s4 + $0x40] sm:$0xff] }
  0x3f   :  { %2925 = vmatprep.mubr.msk.f32.mxu0 %vm481_vm0, %v58_v24  ;;  %2973 = vmatprep.mubr.msk.f32.mxu1 %vm481_vm0, %v90_v25  ;;  %v1294_v25 = vld [vmem:[%s4350_s4 + $0x58] sm:$0xff] }
  0x41   :  { %2926 = vmatmul.mubr.msk.f32.gmra.mrb[26].mxu0 %vm481_vm0, %v59_v26  ;;  %2974 = vmatmul.mubr.msk.f32.gmra.mrb[26].mxu1 %vm481_vm0, %v91_v27  ;;  %v1293_v26 = vld [vmem:[%s4350_s4 + $0x50] sm:$0xff] }
  0x42   :  { %288 = vperm.xlu1 %2987, %v122_v28   ;;  %283 = vperm.xlu0 %2986, %v121_v29   ;;  %v1296_v29 = vld [vmem:[%s4350_s4 + $0x68] sm:$0xff] }
  0x43   :  { %2928 = vmatprep.mubr.msk.f32.mxu0 %vm481_vm0, %v60_v30  ;;  %2976 = vmatprep.mubr.msk.f32.mxu1 %vm481_vm0, %v92_v31  ;;  %v1295_v30 = vld [vmem:[%s4350_s4 + $0x60] sm:$0xff] }
  0x45   :  { %2929 = vmatmul.mubr.msk.f32.gmra.mrb[28].mxu0 %vm481_vm0, %v61_v32  ;;  %2977 = vmatmul.mubr.msk.f32.gmra.mrb[28].mxu1 %vm481_vm0, %v93_v33  ;;  %v1298_v33 = vld [vmem:[%s4350_s4 + $0x78] sm:$0xff] }
  0x46   :  { %208 = vperm.xlu1 %2987, %v106_v34   ;;  %203 = vperm.xlu0 %2986, %v105_v35   ;;  %v1297_v34 = vld [vmem:[%s4350_s4 + $0x70] sm:$0xff] }
  0x47   :  { %2931 = vmatprep.mubr.msk.f32.mxu0 %vm481_vm0, %v62_v36  ;;  %2979 = vmatprep.mubr.msk.f32.mxu1 %vm481_vm0, %v94_v37  ;;  %v1300_v37 = vld [vmem:[%s4350_s4 + $0x88] sm:$0xff] }
  0x49   :  { %2932 = vmatmul.mubr.msk.f32.gmra.mrb[30].mxu0 %vm481_vm0, %v63_v38  ;;  %2980 = vmatmul.mubr.msk.f32.gmra.mrb[30].mxu1 %vm481_vm0, %v95_v39  ;;  %v1299_v38 = vld [vmem:[%s4350_s4 + $0x80] sm:$0xff] }
  0x4a   :  { %448 = vperm.xlu1 %2987, %v154_v40   ;;  %443 = vperm.xlu0 %2986, %v153_v41   ;;  %v1302_v41 = vld [vmem:[%s4350_s4 + $0x98] sm:$0xff] }
  0x4e   :  { %368 = vperm.xlu1 %2987, %v138_v42   ;;  %363 = vperm.xlu0 %2986, %v137_v43   ;;  %v1301_v42 = vld [vmem:[%s4350_s4 + $0x90] sm:$0xff] }
  0x52   :  { %298 = vperm.xlu1 %2987, %v124_v44   ;;  %293 = vperm.xlu0 %2986, %v123_v45   ;;  %v2181_v45 = vld [vmem:[%s4351_s5] sm:$0xff] }
  0x56   :  { %218 = vperm.xlu1 %2987, %v108_v46   ;;  %213 = vperm.xlu0 %2986, %v107_v47   ;;  %v1303_v46 = vld [vmem:[%s4350_s4 + $0xa0] sm:$0xff] }
  0x5a   :  { %458 = vperm.xlu1 %2987, %v156_v48   ;;  %453 = vperm.xlu0 %2986, %v155_v49   ;;  %v2183_v49 = vld [vmem:[%s4351_s5 + $0x10] sm:$0xff] }
  0x5e   :  { %378 = vperm.xlu1 %2987, %v140_v50   ;;  %373 = vperm.xlu0 %2986, %v139_v51   ;;  %v2182_v50 = vld [vmem:[%s4351_s5 + $0x8] sm:$0xff]  ;;  %v2990_v51 = vld [vmem:[%s4352_s3 + $0x4] ss:$16 sps:$4 sm:$0xff]  }
  0x5f   :  { %1827 = vmatprep.mubr.bf16.mxu1 %v2990_v51 }
  0x62   :  { %308 = vperm.xlu1 %2987, %v126_v52   ;;  %303 = vperm.xlu0 %2986, %v125_v53   ;;  %v2993_v52 = vld [vmem:[%s4352_s3 + $0xc] ss:$16 sps:$4 sm:$0xff]  }
  0x63   :  { %1988 = vmatprep.mubr.bf16.mxu0 %v2993_v52 }
  0x66   :  { %228 = vperm.xlu1 %2987, %v110_v54   ;;  %223 = vperm.xlu0 %2986, %v109_v55   ;;  %v2185_v55 = vld [vmem:[%s4351_s5 + $0x20] sm:$0xff] }
  0x6a   :  { %468 = vperm.xlu1 %2987, %v158_v56   ;;  %463 = vperm.xlu0 %2986, %v157_v57   ;;  %v2184_v56 = vld [vmem:[%s4351_s5 + $0x18] sm:$0xff] }
  0x6e   :  { %388 = vperm.xlu1 %2987, %v142_v58   ;;  %383 = vperm.xlu0 %2986, %v141_v59   ;;  %v2187_v59 = vld [vmem:[%s4351_s5 + $0x30] sm:$0xff] }
  0x72   :  { %318 = vperm.xlu1 %2987, %v128_v60   ;;  %313 = vperm.xlu0 %2986, %v127_v61   ;;  %v2186_v60 = vld [vmem:[%s4351_s5 + $0x28] sm:$0xff] }
  0x76   :  { %238 = vperm.xlu1 %2987, %v112_v62   ;;  %233 = vperm.xlu0 %2986, %v111_v63   ;;  %v2189_v63 = vld [vmem:[%s4351_s5 + $0x40] sm:$0xff] }
  0x7a   :  { %478 = vperm.xlu1 %2987, %v160_v0   ;;  %473 = vperm.xlu0 %2986, %v159_v1   ;;  %v2188_v0 = vld [vmem:[%s4351_s5 + $0x38] sm:$0xff] }
  0x7e   :  { %398 = vperm.xlu1 %2987, %v144_v2   ;;  %393 = vperm.xlu0 %2986, %v143_v3   ;;  %v2191_v3 = vld [vmem:[%s4351_s5 + $0x50] sm:$0xff] }
  0x81   :  { %v3590_v7 = vpop.permute.xlu1 %173  ;;  %v3592_v8 = vpop.permute.xlu0 %163 }
  0x82   :  { %1322 = vperm.xlu1 %2987, %v1284_v5   ;;  %1317 = vperm.xlu0 %2986, %v1283_v6  }
  0x85   :  { %v3600_v11 = vpop.permute.xlu1 %178  ;;  %v3602_v12 = vpop.permute.xlu0 %168 }
  0x86   :  { %1332 = vperm.xlu1 %2987, %v1286_v9   ;;  %1327 = vperm.xlu0 %2986, %v1285_v10   ;;  %v2193_v9 = vld [vmem:[%s4351_s5 + $0x60] sm:$0xff]  ;;  %v2192_v10 = vld [vmem:[%s4351_s5 + $0x58] sm:$0xff] }
  0x89   :  { %v3610_v15 = vpop.permute.xlu1 %248  ;;  %v3612_v16 = vpop.permute.xlu0 %243 }
  0x8a   :  { %1342 = vperm.xlu1 %2987, %v1288_v13   ;;  %1337 = vperm.xlu0 %2986, %v1287_v14  }
  0x8d   :  { %v3620_v19 = vpop.permute.xlu1 %408  ;;  %v3622_v20 = vpop.permute.xlu0 %403 }
  0x8e   :  { %1352 = vperm.xlu1 %2987, %v1290_v17   ;;  %1347 = vperm.xlu0 %2986, %v1289_v18   ;;  %v2195_v17 = vld [vmem:[%s4351_s5 + $0x70] sm:$0xff]  ;;  %v2194_v18 = vld [vmem:[%s4351_s5 + $0x68] sm:$0xff] }
  0x91   :  { %v3630_v23 = vpop.permute.xlu1 %328  ;;  %v3632_v24 = vpop.permute.xlu0 %323 }
  0x92   :  { %1362 = vperm.xlu1 %2987, %v1292_v21   ;;  %1357 = vperm.xlu0 %2986, %v1291_v22  }
  0x95   :  { %v3640_v27 = vpop.permute.xlu1 %258  ;;  %v3642_v28 = vpop.permute.xlu0 %253 }
  0x96   :  { %1372 = vperm.xlu1 %2987, %v1294_v25   ;;  %1367 = vperm.xlu0 %2986, %v1293_v26   ;;  %v2197_v25 = vld [vmem:[%s4351_s5 + $0x80] sm:$0xff]  ;;  %v2196_v26 = vld [vmem:[%s4351_s5 + $0x78] sm:$0xff] }
  0x99   :  { %v3650_v31 = vpop.permute.xlu1 %418  ;;  %v3652_v32 = vpop.permute.xlu0 %413 }
  0x9a   :  { %1382 = vperm.xlu1 %2987, %v1296_v29   ;;  %1377 = vperm.xlu0 %2986, %v1295_v30  }
  0x9d   :  { %v3660_v35 = vpop.permute.xlu1 %338  ;;  %v3662_v36 = vpop.permute.xlu0 %333 }
  0x9e   :  { %1392 = vperm.xlu1 %2987, %v1298_v33   ;;  %1387 = vperm.xlu0 %2986, %v1297_v34   ;;  %v2198_v33 = vld [vmem:[%s4351_s5 + $0x88] sm:$0xff] }
  0x9f   :  { %v1304_v34 = vld [vmem:[%s4350_s4 + $0xa8] sm:$0xff] }
  0xa1   :  { %v3670_v39 = vpop.permute.xlu1 %268  ;;  %v3672_v40 = vpop.permute.xlu0 %263 }
  0xa2   :  { %1402 = vperm.xlu1 %2987, %v1300_v37   ;;  %1397 = vperm.xlu0 %2986, %v1299_v38  }
  0xa5   :  { %v3680_v43 = vpop.permute.xlu1 %188  ;;  %v3682_v44 = vpop.permute.xlu0 %183 }
  0xa6   :  { %1412 = vperm.xlu1 %2987, %v1302_v41   ;;  %1407 = vperm.xlu0 %2986, %v1301_v42   ;;  %v2199_v41 = vld [vmem:[%s4351_s5 + $0x90] sm:$0xff] }
  0xa7   :  { %v1305_v42 = vld [vmem:[%s4350_s4 + $0xb0] sm:$0xff] }
  0xa9   :  { %v3690_v47 = vpop.permute.xlu1 %428  ;;  %v3692_v48 = vpop.permute.xlu0 %423 }
  0xaa   :  { %2215 = vperm.xlu1 %2987, %v2181_v45   ;;  %1417 = vperm.xlu0 %2986, %v1303_v46  }
  0xad   :  { %v3706_v53 = vpop.permute.xlu1 %348  ;;  %v3708_v54 = vpop.permute.xlu0 %343 }
  0xae   :  { %2225 = vperm.xlu1 %2987, %v2183_v49   ;;  %2220 = vperm.xlu0 %2986, %v2182_v50   ;;  %v2200_v49 = vld [vmem:[%s4351_s5 + $0x98] sm:$0xff] }
  0xaf   :  { %v1306_v50 = vld [vmem:[%s4350_s4 + $0xb8] sm:$0xff] }
  0xb1   :  { %v3716_v57 = vpop.permute.xlu1 %278  ;;  %v3718_v58 = vpop.permute.xlu0 %273 }
  0xb2   :  { %2235 = vperm.xlu1 %2987, %v2185_v55   ;;  %2230 = vperm.xlu0 %2986, %v2184_v56   ;;  %v2201_v55 = vld [vmem:[%s4351_s5 + $0xa0] sm:$0xff] }
  0xb3   :  { %v1307_v56 = vld [vmem:[%s4350_s4 + $0xc0] sm:$0xff] }
  0xb5   :  { %v3726_v61 = vpop.permute.xlu1 %198  ;;  %v3728_v62 = vpop.permute.xlu0 %193 }
  0xb6   :  { %2245 = vperm.xlu1 %2987, %v2187_v59   ;;  %2240 = vperm.xlu0 %2986, %v2186_v60  }
  0xb9   :  { %v3736_v1 = vpop.permute.xlu1 %438  ;;  %v3738_v2 = vpop.permute.xlu0 %433 }
  0xba   :  { %2255 = vperm.xlu1 %2987, %v2189_v63   ;;  %2250 = vperm.xlu0 %2986, %v2188_v0   ;;  %v2202_v63 = vld [vmem:[%s4351_s5 + $0xa8] sm:$0xff] }
  0xbb   :  { %v1308_v0 = vld [vmem:[%s4350_s4 + $0xc8] sm:$0xff] }
  0xbd   :  { %v3746_v5 = vpop.permute.xlu1 %358  ;;  %v3748_v6 = vpop.permute.xlu0 %353 }
  0xbe   :  { %2265 = vperm.xlu1 %2987, %v2191_v3   ;;  %2260 = vperm.xlu0 %2986, %v2190_v4  }
  0xc1   :  { %v3756_v13 = vpop.permute.xlu1 %288  ;;  %v3758_v14 = vpop.permute.xlu0 %283 }
  0xc2   :  { %2275 = vperm.xlu1 %2987, %v2193_v9   ;;  %2270 = vperm.xlu0 %2986, %v2192_v10   ;;  %v2203_v9 = vld [vmem:[%s4351_s5 + $0xb0] sm:$0xff] }
  0xc3   :  { %v1309_v10 = vld [vmem:[%s4350_s4 + $0xd0] sm:$0xff] }
  0xc5   :  { %v3766_v21 = vpop.permute.xlu1 %208  ;;  %v3768_v22 = vpop.permute.xlu0 %203 }
  0xc6   :  { %2285 = vperm.xlu1 %2987, %v2195_v17   ;;  %2280 = vperm.xlu0 %2986, %v2194_v18  }
  0xc9   :  { %v3776_v29 = vpop.permute.xlu1 %448  ;;  %v3778_v30 = vpop.permute.xlu0 %443 }
  0xca   :  { %4354 = vst [vmem:[#allocation4_spill] sm:$0xff] %v3778_v30  ;;  %2295 = vperm.xlu1 %2987, %v2197_v25   ;;  %2290 = vperm.xlu0 %2986, %v2196_v26  }
  0xcd   :  { %v3786_v37 = vpop.permute.xlu1 %368  ;;  %v3788_v38 = vpop.permute.xlu0 %363 }
  0xce   :  { %2300 = vperm.xlu1 %2987, %v2198_v33   ;;  %1422 = vperm.xlu0 %2986, %v1304_v34  }
  0xd1   :  { %v3796_v45 = vpop.permute.xlu1 %298  ;;  %v3798_v46 = vpop.permute.xlu0 %293 }
  0xd2   :  { %4355 = vst [vmem:[#allocation5_spill] sm:$0xff] %v3796_v45  ;;  %4356 = vst [vmem:[#allocation6_spill] sm:$0xff] %v3798_v46  ;;  %2305 = vperm.xlu1 %2987, %v2199_v41   ;;  %1427 = vperm.xlu0 %2986, %v1305_v42  }
  0xd5   :  { %v3806_v51 = vpop.permute.xlu1 %218  ;;  %v3808_v52 = vpop.permute.xlu0 %213 }
  0xd6   :  { %2310 = vperm.xlu1 %2987, %v2200_v49   ;;  %1432 = vperm.xlu0 %2986, %v1306_v50  }
  0xd9   :  { %v3816_v59 = vpop.permute.xlu1 %458  ;;  %v3818_v60 = vpop.permute.xlu0 %453 }
  0xda   :  { %4357 = vst [vmem:[#allocation7_spill] sm:$0xff] %v3816_v59  ;;  %4358 = vst [vmem:[#allocation8_spill] sm:$0xff] %v3818_v60  ;;  %2315 = vperm.xlu1 %2987, %v2201_v55   ;;  %1437 = vperm.xlu0 %2986, %v1307_v56  }
  0xdd   :  { %v3826_v3 = vpop.permute.xlu1 %378  ;;  %v3828_v4 = vpop.permute.xlu0 %373 }
  0xde   :  { %2320 = vperm.xlu1 %2987, %v2202_v63   ;;  %1442 = vperm.xlu0 %2986, %v1308_v0  }
  0xe0   :  { %v2888_v17 = vpop.f32.mrb[0].mxu0  ;;  %v2936_v18 = vpop.f32.mrb[0].mxu1 }
  0xe1   :  { %v746_v25 = vadd.f32 %v2888_v17, %v3602_v12  ;;  %v906_v26 = vadd.f32 %v2936_v18, %v3630_v23  ;;  %v740_v33 = vpop.f32.mrb[1].mxu0  ;;  %v900_v34 = vpop.f32.mrb[1].mxu1  ;;  %v2204_v12 = vld [vmem:[%s4351_s5 + $0xb8] sm:$0xff] }
  0xe2   :  { %v741_v41 = vadd.f32 %v740_v33, %v3592_v8  ;;  %v901_v42 = vadd.f32 %v900_v34, %v3632_v24  ;;  %v3840_v49 = vpop.permute.xlu1 %308  ;;  %v3842_v50 = vpop.permute.xlu0 %303  ;;  %2325 = vperm.xlu1 %2987, %v2203_v9   ;;  %1447 = vperm.xlu0 %2986, %v1309_v10   ;;  %v1310_v23 = vld [vmem:[%s4350_s4 + $0xd8] sm:$0xff] }
  0xe3   :  { %4359 = vst [vmem:[#allocation9_spill] sm:$0xff] %v3840_v49  ;;  %4360 = vst [vmem:[#allocation10_spill] sm:$0xff] %v3842_v50  ;;  %v1060_v55 = vmul.f32 0.2, %v746_v25  ;;  %v1092_v56 = vmul.f32 0.2, %v906_v26 }
  0xe4   :  { %v1059_v63 = vmul.f32 0.2, %v741_v41  ;;  %v1091_v8 = vmul.f32 0.2, %v901_v42  ;;  %v2891_v0 = vpop.f32.mrb[2].mxu0  ;;  %v2939_v24 = vpop.f32.mrb[2].mxu1 }
  0xe5   :  { %v1124_v17 = vmax.f32 %v746_v25, %v1060_v55  ;;  %v1156_v18 = vmax.f32 %v906_v26, %v1092_v56  ;;  %v756_v33 = vadd.f32 %v2891_v0, %v3600_v11  ;;  %v916_v9 = vadd.f32 %v2939_v24, %v3660_v35  ;;  %v750_v10 = vpop.f32.mrb[3].mxu0  ;;  %v910_v34 = vpop.f32.mrb[3].mxu1  ;;  %v2205_v11 = vld [vmem:[%s4351_s5 + $0xc0] sm:$0xff] }
  0xe6   :  { %v1123_v50 = vmax.f32 %v741_v41, %v1059_v63  ;;  %v1155_v49 = vmax.f32 %v901_v42, %v1091_v8  ;;  %v751_v60 = vadd.f32 %v750_v10, %v3590_v7  ;;  %v911_v46 = vadd.f32 %v910_v34, %v3662_v36  ;;  %v3854_v59 = vpop.permute.xlu1 %228  ;;  %v3856_v45 = vpop.permute.xlu0 %223  ;;  %2330 = vperm.xlu1 %2987, %v2204_v12   ;;  %v1311_v35 = vld [vmem:[%s4350_s4 + $0xe0] sm:$0xff] }
  0xe7   :  { %v1062_v30 = vmul.f32 0.2, %v756_v33  ;;  %v1094_v25 = vmul.f32 0.2, %v916_v9  ;;  %1452 = vperm.xlu0 %2986, %v1310_v23  }
  0xe8   :  { %v3864_v26 = vpack.c.bf16 %v1124_v17, %v1123_v50  ;;  %v3866_v7 = vpack.c.bf16 %v1156_v18, %v1155_v49  ;;  %v1061_v36 = vmul.f32 0.2, %v751_v60  ;;  %v1093_v41 = vmul.f32 0.2, %v911_v46  ;;  %v2894_v42 = vpop.f32.mrb[4].mxu0  ;;  %v2942_v55 = vpop.f32.mrb[4].mxu1 }
  0xe9   :  { %v1126_v56 = vmax.f32 %v756_v33, %v1062_v30  ;;  %v1158_v12 = vmax.f32 %v916_v9, %v1094_v25  ;;  %v766_v23 = vadd.f32 %v2894_v42, %v3680_v43  ;;  %v926_v63 = vadd.f32 %v2942_v55, %v3706_v53  ;;  %v760_v8 = vpop.f32.mrb[5].mxu0  ;;  %v920_v0 = vpop.f32.mrb[5].mxu1  ;;  %v2206_v43 = vld [vmem:[%s4351_s5 + $0xc8] sm:$0xff] }
  0xea   :  { %v1125_v24 = vmax.f32 %v751_v60, %v1061_v36  ;;  %v1157_v10 = vmax.f32 %v911_v46, %v1093_v41  ;;  %v761_v34 = vadd.f32 %v760_v8, %v3682_v44  ;;  %v921_v50 = vadd.f32 %v920_v0, %v3708_v54  ;;  %v3872_v49 = vpop.permute.xlu1 %468  ;;  %v3874_v17 = vpop.permute.xlu0 %463  ;;  %2335 = vperm.xlu1 %2987, %v2205_v11   ;;  %v1312_v53 = vld [vmem:[%s4350_s4 + $0xe8] sm:$0xff] }
  0xeb   :  { %v1064_v18 = vmul.f32 0.2, %v766_v23  ;;  %v1096_v30 = vmul.f32 0.2, %v926_v63  ;;  %1457 = vperm.xlu0 %2986, %v1311_v35  }
  0xec   :  { %v3882_v46 = vpack.c.bf16 %v1126_v56, %v1125_v24  ;;  %v3884_v44 = vpack.c.bf16 %v1158_v12, %v1157_v10  ;;  %v1063_v54 = vmul.f32 0.2, %v761_v34  ;;  %v1095_v60 = vmul.f32 0.2, %v921_v50  ;;  %v2897_v33 = vpop.f32.mrb[6].mxu0  ;;  %v2945_v9 = vpop.f32.mrb[6].mxu1 }
  0xed   :  { %v1128_v25 = vmax.f32 %v766_v23, %v1064_v18  ;;  %v1160_v11 = vmax.f32 %v926_v63, %v1096_v30  ;;  %v776_v35 = vadd.f32 %v2897_v33, %v3726_v61  ;;  %v936_v36 = vadd.f32 %v2945_v9, %v3746_v5  ;;  %v770_v41 = vpop.f32.mrb[7].mxu0  ;;  %v930_v42 = vpop.f32.mrb[7].mxu1  ;;  %v2207_v61 = vld [vmem:[%s4351_s5 + $0xd0] sm:$0xff] }
  0xee   :  { %v1127_v55 = vmax.f32 %v761_v34, %v1063_v54  ;;  %v1159_v8 = vmax.f32 %v921_v50, %v1095_v60  ;;  %v771_v0 = vadd.f32 %v770_v41, %v3728_v62  ;;  %v931_v56 = vadd.f32 %v930_v42, %v3748_v6  ;;  %v3890_v12 = vpop.permute.xlu1 %388  ;;  %v3892_v24 = vpop.permute.xlu0 %383  ;;  %2340 = vperm.xlu1 %2987, %v2206_v43   ;;  %v1313_v5 = vld [vmem:[%s4350_s4 + $0xf0] sm:$0xff] }
  0xef   :  { %v1066_v10 = vmul.f32 0.2, %v776_v35  ;;  %v1098_v23 = vmul.f32 0.2, %v936_v36  ;;  %1462 = vperm.xlu0 %2986, %v1312_v53  }
  0xf0   :  { %v3900_v63 = vpack.c.bf16 %v1128_v25, %v1127_v55  ;;  %v3902_v62 = vpack.c.bf16 %v1160_v11, %v1159_v8  ;;  %v1065_v6 = vmul.f32 0.2, %v771_v0  ;;  %v1097_v34 = vmul.f32 0.2, %v931_v56  ;;  %v2900_v50 = vpop.f32.mrb[8].mxu0  ;;  %v2948_v18 = vpop.f32.mrb[8].mxu1 }
  0xf1   :  { %v1130_v30 = vmax.f32 %v776_v35, %v1066_v10  ;;  %v1162_v43 = vmax.f32 %v936_v36, %v1098_v23  ;;  %v786_v53 = vadd.f32 %v2900_v50, %v3766_v21  ;;  %v946_v54 = vadd.f32 %v2948_v18, %v3786_v37  ;;  %v780_v60 = vpop.f32.mrb[9].mxu0  ;;  %v940_v33 = vpop.f32.mrb[9].mxu1  ;;  %v2208_v21 = vld [vmem:[%s4351_s5 + $0xd8] sm:$0xff] }
  0xf2   :  { %v1129_v9 = vmax.f32 %v771_v0, %v1065_v6  ;;  %v1161_v41 = vmax.f32 %v931_v56, %v1097_v34  ;;  %v781_v42 = vadd.f32 %v780_v60, %v3768_v22  ;;  %v941_v25 = vadd.f32 %v940_v33, %v3788_v38  ;;  %v3908_v11 = vpop.permute.xlu1 %318  ;;  %v3910_v55 = vpop.permute.xlu0 %313  ;;  %2345 = vperm.xlu1 %2987, %v2207_v61   ;;  %v1314_v37 = vld [vmem:[%s4350_s4 + $0xf8] sm:$0xff] }
  0xf3   :  { %4361 = vst [vmem:[#allocation11_spill] sm:$0xff] %v3910_v55  ;;  %v1068_v8 = vmul.f32 0.2, %v786_v53  ;;  %v1100_v35 = vmul.f32 0.2, %v946_v54  ;;  %1467 = vperm.xlu0 %2986, %v1313_v5  }
  0xf4   :  { %v3918_v36 = vpack.c.bf16 %v1130_v30, %v1129_v9  ;;  %v3920_v22 = vpack.c.bf16 %v1162_v43, %v1161_v41  ;;  %v1067_v38 = vmul.f32 0.2, %v781_v42  ;;  %v1099_v0 = vmul.f32 0.2, %v941_v25  ;;  %v2903_v56 = vpop.f32.mrb[10].mxu0  ;;  %v2951_v10 = vpop.f32.mrb[10].mxu1 }
  0xf5   :  { %v1132_v23 = vmax.f32 %v786_v53, %v1068_v8  ;;  %v1164_v61 = vmax.f32 %v946_v54, %v1100_v35  ;;  %v796_v5 = vadd.f32 %v2903_v56, %v3806_v51  ;;  %v956_v6 = vadd.f32 %v2951_v10, %v3826_v3  ;;  %v790_v34 = vpop.f32.mrb[11].mxu0  ;;  %v950_v50 = vpop.f32.mrb[11].mxu1  ;;  %v2210_v51 = vld [vmem:[%s4351_s5 + $0xe8] sm:$0xff]  ;;  %v2209_v3 = vld [vmem:[%s4351_s5 + $0xe0] sm:$0xff] }
  0xf6   :  { %v1131_v18 = vmax.f32 %v781_v42, %v1067_v38  ;;  %v1163_v60 = vmax.f32 %v941_v25, %v1099_v0  ;;  %v791_v33 = vadd.f32 %v790_v34, %v3808_v52  ;;  %v951_v30 = vadd.f32 %v950_v50, %v3828_v4  ;;  %v239_v43 = vpop.permute.xlu1 %238  ;;  %v234_v9 = vpop.permute.xlu0 %233  ;;  %2350 = vperm.xlu1 %2987, %v2208_v21  }
  0xf7   :  { %v1070_v41 = vmul.f32 0.2, %v796_v5  ;;  %v1102_v55 = vmul.f32 0.2, %v956_v6  ;;  %1472 = vperm.xlu0 %2986, %v1314_v37  }
  0xf8   :  { %v3932_v53 = vpack.c.bf16 %v1132_v23, %v1131_v18  ;;  %v3934_v54 = vpack.c.bf16 %v1164_v61, %v1163_v60  ;;  %v1069_v52 = vmul.f32 0.2, %v791_v33  ;;  %v1101_v4 = vmul.f32 0.2, %v951_v30  ;;  %v2906_v42 = vpop.f32.mrb[12].mxu0  ;;  %v2954_v25 = vpop.f32.mrb[12].mxu1 }
  0xf9   :  { %v1134_v8 = vmax.f32 %v796_v5, %v1070_v41  ;;  %v1166_v35 = vmax.f32 %v956_v6, %v1102_v55  ;;  %v806_v21 = vadd.f32 %v2906_v42, %v3854_v59  ;;  %v966_v37 = vadd.f32 %v2954_v25, %v3890_v12  ;;  %v800_v38 = vpop.f32.mrb[13].mxu0  ;;  %v960_v0 = vpop.f32.mrb[13].mxu1  ;;  %v2212_v59 = vld [vmem:[%s4351_s5 + $0xf8] sm:$0xff]  ;;  %v2211_v12 = vld [vmem:[%s4351_s5 + $0xf0] sm:$0xff] }
  0xfa   :  { %v1133_v56 = vmax.f32 %v791_v33, %v1069_v52  ;;  %v1165_v10 = vmax.f32 %v951_v30, %v1101_v4  ;;  %v801_v34 = vadd.f32 %v800_v38, %v3856_v45  ;;  %v961_v23 = vadd.f32 %v960_v0, %v3892_v24  ;;  %v3940_v61 = vpop.permute.xlu1 %478  ;;  %v3942_v50 = vpop.permute.xlu0 %473  ;;  %2360 = vperm.xlu1 %2987, %v2210_v51  }
  0xfb   :  { %4362 = vst [vmem:[#allocation12_spill] sm:$0xff] %v3942_v50  ;;  %v1072_v18 = vmul.f32 0.2, %v806_v21  ;;  %v1104_v5 = vmul.f32 0.2, %v966_v37  ;;  %2355 = vperm.xlu0 %2986, %v2209_v3  }
  0xfc   :  { %v3950_v55 = vpack.c.bf16 %v1134_v8, %v1133_v56  ;;  %v3952_v45 = vpack.c.bf16 %v1166_v35, %v1165_v10  ;;  %v1071_v24 = vmul.f32 0.2, %v801_v34  ;;  %v1103_v6 = vmul.f32 0.2, %v961_v23  ;;  %v2909_v60 = vpop.f32.mrb[14].mxu0  ;;  %v2957_v33 = vpop.f32.mrb[14].mxu1 }
  0xfd   :  { %v1136_v30 = vmax.f32 %v806_v21, %v1072_v18  ;;  %v1168_v41 = vmax.f32 %v966_v37, %v1104_v5  ;;  %v816_v51 = vadd.f32 %v2909_v60, %v239_v43  ;;  %v810_v3 = vpop.f32.mrb[15].mxu0  ;;  %v970_v52 = vpop.f32.mrb[15].mxu1  ;;  %v2442_v43 = vld [vmem:[#allocation3] sm:$0x1] }
  0xfe   :  { %4363 = vst [vmem:[#allocation13_spill] sm:$0xff] %v3952_v45  ;;  %v1135_v4 = vmax.f32 %v801_v34, %v1071_v24  ;;  %v1167_v42 = vmax.f32 %v961_v23, %v1103_v6  ;;  %v811_v25 = vadd.f32 %v810_v3, %v234_v9  ;;  %v399_v38 = vpop.permute.xlu1 %398  ;;  %v394_v0 = vpop.permute.xlu0 %393  ;;  %2370 = vperm.xlu1 %2987, %v2212_v59  }
  0xff   :  { %v1074_v50 = vmul.f32 0.2, %v816_v51  ;;  %v976_v8 = vadd.f32 %v2957_v33, %v399_v38  ;;  %v971_v56 = vadd.f32 %v970_v52, %v394_v0  ;;  %2365 = vperm.xlu0 %2986, %v2211_v12  }
 0x100   :  { %v3954_v35 = vpack.c.bf16 %v1136_v30, %v1135_v4  ;;  %v3956_v10 = vpack.c.bf16 %v1168_v41, %v1167_v42  ;;  %v1073_v45 = vmul.f32 0.2, %v811_v25  ;;  %v2912_v21 = vpop.f32.mrb[16].mxu0  ;;  %v2960_v37 = vpop.f32.mrb[16].mxu1 }
 0x101   :  { %v1138_v18 = vmax.f32 %v816_v51, %v1074_v50  ;;  %v1106_v5 = vmul.f32 0.2, %v976_v8  ;;  %v1105_v34 = vmul.f32 0.2, %v971_v56  ;;  %v826_v9 = vadd.f32 %v2912_v21, %v3610_v15  ;;  %v820_v23 = vpop.f32.mrb[17].mxu0  ;;  %v980_v24 = vpop.f32.mrb[17].mxu1 }
 0x102   :  { %v1137_v59 = vmax.f32 %v811_v25, %v1073_v45  ;;  %v986_v6 = vadd.f32 %v2960_v37, %v3620_v19  ;;  %v821_v12 = vadd.f32 %v820_v23, %v3612_v16  ;;  %v981_v60 = vadd.f32 %v980_v24, %v3622_v20 }
 0x103   :  { %v1170_v33 = vmax.f32 %v976_v8, %v1106_v5  ;;  %v1169_v30 = vmax.f32 %v971_v56, %v1105_v34  ;;  %v1076_v41 = vmul.f32 0.2, %v826_v9  ;;  %2445 = vperm.xlu0 %2986, %v2442_v43  }
 0x104   :  { %v3962_v3 = vpack.c.bf16 %v1138_v18, %v1137_v59  ;;  %v1108_v50 = vmul.f32 0.2, %v986_v6  ;;  %v1075_v51 = vmul.f32 0.2, %v821_v12  ;;  %v1107_v52 = vmul.f32 0.2, %v981_v60 }
 0x105   :  { %v3964_v4 = vpack.c.bf16 %v1170_v33, %v1169_v30  ;;  %v1140_v15 = vmax.f32 %v826_v9, %v1076_v41  ;;  %v2915_v42 = vpop.f32.mrb[18].mxu0  ;;  %v2963_v45 = vpop.f32.mrb[18].mxu1 }
 0x106   :  { %v1172_v25 = vmax.f32 %v986_v6, %v1108_v50  ;;  %v1139_v19 = vmax.f32 %v821_v12, %v1075_v51  ;;  %v1171_v38 = vmax.f32 %v981_v60, %v1107_v52  ;;  %v836_v16 = vadd.f32 %v2915_v42, %v3640_v27  ;;  %v830_v20 = vpop.f32.mrb[19].mxu0  ;;  %v990_v0 = vpop.f32.mrb[19].mxu1 }
 0x107   :  { %v996_v8 = vadd.f32 %v2963_v45, %v3650_v31  ;;  %v831_v56 = vadd.f32 %v830_v20, %v3642_v28  ;;  %v991_v21 = vadd.f32 %v990_v0, %v3652_v32 }
 0x108   :  { %v1078_v37 = vmul.f32 0.2, %v836_v16  ;;  %v2918_v43 = vpop.f32.mrb[20].mxu0  ;;  %v2966_v18 = vpop.f32.mrb[20].mxu1  ;;  %v1259_v5 = vpack.c.bf16 %v1140_v15, %v1139_v19  ;;  %v1275_v34 = vpack.c.bf16 %v1172_v25, %v1171_v38 }
 0x109   :  { %v1110_v9 = vmul.f32 0.2, %v996_v8  ;;  %v1077_v23 = vmul.f32 0.2, %v831_v56  ;;  %v1109_v24 = vmul.f32 0.2, %v991_v21  ;;  %v846_v59 = vadd.f32 %v2918_v43, %v3670_v39 }
 0x10a   :  { %v1142_v6 = vmax.f32 %v836_v16, %v1078_v37  ;;  %v1006_v27 = vadd.f32 %v2966_v18, %v3690_v47  ;;  %v840_v12 = vpop.f32.mrb[21].mxu0  ;;  %v1000_v60 = vpop.f32.mrb[21].mxu1  ;;  %2660 = vmatprep.subr.bf16.mxu1 %v1259_v5  ;;  %2772 = vmatprep.subr.bf16.mxu0 %v1275_v34 }
 0x10b   :  { %v1174_v28 = vmax.f32 %v996_v8, %v1110_v9  ;;  %v1141_v31 = vmax.f32 %v831_v56, %v1077_v23  ;;  %v1173_v32 = vmax.f32 %v991_v21, %v1109_v24  ;;  %v1080_v33 = vmul.f32 0.2, %v846_v59  ;;  %2661 = vmatpush3.bf16.msra.mxu1 %v3864_v26  ;;  %2773 = vmatpush3.bf16.msra.mxu0 %v3866_v7  ;;  %v4364_v23 = vld [vmem:[#allocation4_spill] sm:$0xff] }
 0x10c   :  { %v1112_v30 = vmul.f32 0.2, %v1006_v27  ;;  %v841_v41 = vadd.f32 %v840_v12, %v3672_v40  ;;  %v1001_v39 = vadd.f32 %v1000_v60, %v3692_v48  ;;  %v2921_v50 = vpop.f32.mrb[22].mxu0  ;;  %v2969_v51 = vpop.f32.mrb[22].mxu1 }
 0x10d   :  { %v1144_v47 = vmax.f32 %v846_v59, %v1080_v33  ;;  %v856_v52 = vadd.f32 %v2921_v50, %v3716_v57  ;;  %v1016_v15 = vadd.f32 %v2969_v51, %v3736_v1  ;;  %v850_v42 = vpop.f32.mrb[23].mxu0  ;;  %v1010_v45 = vpop.f32.mrb[23].mxu1  ;;  %v1260_v25 = vpack.c.bf16 %v1142_v6, %v1141_v31  ;;  %v4365_v50 = vld [vmem:[#allocation5_spill] sm:$0xff] }
 0x10e   :  { %v1176_v19 = vmax.f32 %v1006_v27, %v1112_v30  ;;  %v1079_v38 = vmul.f32 0.2, %v841_v41  ;;  %v1111_v26 = vmul.f32 0.2, %v1001_v39  ;;  %v851_v7 = vadd.f32 %v850_v42, %v3718_v58 }
 0x10f   :  { %v1082_v16 = vmul.f32 0.2, %v856_v52  ;;  %v1114_v20 = vmul.f32 0.2, %v1016_v15  ;;  %v1011_v40 = vadd.f32 %v1010_v45, %v3738_v2  ;;  %2662 = vmatprep.subr.bf16.mxu1 %v1260_v25  ;;  %v1276_v48 = vpack.c.bf16 %v1174_v28, %v1173_v32  ;;  %v4368_v45 = vld [vmem:[#allocation8_spill] sm:$0xff] }
 0x110   :  { %v1143_v0 = vmax.f32 %v841_v41, %v1079_v38  ;;  %v1175_v8 = vmax.f32 %v1001_v39, %v1111_v26  ;;  %v1081_v56 = vmul.f32 0.2, %v851_v7  ;;  %2663 = vmatpush3.bf16.msra.mxu1 %v3882_v46  ;;  %v2924_v57 = vpop.f32.mrb[24].mxu0  ;;  %v2972_v1 = vpop.f32.mrb[24].mxu1 }
 0x111   :  { %v1146_v21 = vmax.f32 %v856_v52, %v1082_v16  ;;  %v1178_v37 = vmax.f32 %v1016_v15, %v1114_v20  ;;  %v1113_v43 = vmul.f32 0.2, %v1011_v40  ;;  %2774 = vmatprep.subr.bf16.mxu0 %v1276_v48  ;;  %v866_v18 = vadd.f32 %v2924_v57, %v3756_v13  ;;  %v860_v58 = vpop.f32.mrb[25].mxu0  ;;  %v1020_v5 = vpop.f32.mrb[25].mxu1  ;;  %v4367_v15 = vld [vmem:[#allocation6_spill] sm:$0xff] }
 0x112   :  { %v1145_v34 = vmax.f32 %v851_v7, %v1081_v56  ;;  %2775 = vmatpush3.bf16.msra.mxu0 %v3884_v44  ;;  %v1026_v2 = vadd.f32 %v2972_v1, %v3776_v29  ;;  %v861_v9 = vadd.f32 %v860_v58, %v3758_v14  ;;  %v1021_v24 = vadd.f32 %v1020_v5, %v4364_v23  ;;  %v4370_v58 = vld [vmem:[#allocation10_spill] sm:$0xff] }
 0x113   :  { %v1177_v46 = vmax.f32 %v1011_v40, %v1113_v43  ;;  %v1084_v59 = vmul.f32 0.2, %v866_v18  ;;  %v1261_v6 = vpack.c.bf16 %v1144_v47, %v1143_v0  ;;  %v1277_v27 = vpack.c.bf16 %v1176_v19, %v1175_v8  ;;  %v4366_v47 = vld [vmem:[#allocation7_spill] sm:$0xff] }
 0x114   :  { %v1116_v12 = vmul.f32 0.2, %v1026_v2  ;;  %v1083_v60 = vmul.f32 0.2, %v861_v9  ;;  %v1115_v28 = vmul.f32 0.2, %v1021_v24  ;;  %v1262_v31 = vpack.c.bf16 %v1146_v21, %v1145_v34 }
 0x115   :  { %v1148_v13 = vmax.f32 %v866_v18, %v1084_v59  ;;  %2664 = vmatprep.subr.bf16.mxu1 %v1261_v6  ;;  %2776 = vmatprep.subr.bf16.mxu0 %v1277_v27  ;;  %v2927_v32 = vpop.f32.mrb[26].mxu0  ;;  %v2975_v33 = vpop.f32.mrb[26].mxu1  ;;  %v1278_v44 = vpack.c.bf16 %v1178_v37, %v1177_v46 }
 0x116   :  { %v1180_v30 = vmax.f32 %v1026_v2, %v1116_v12  ;;  %v1147_v29 = vmax.f32 %v861_v9, %v1083_v60  ;;  %v1179_v41 = vmax.f32 %v1021_v24, %v1115_v28  ;;  %2665 = vmatpush3.bf16.msra.mxu1 %v3900_v63  ;;  %2777 = vmatpush3.bf16.msra.mxu0 %v3902_v62  ;;  %v870_v14 = vpop.f32.mrb[27].mxu0  ;;  %v1030_v39 = vpop.f32.mrb[27].mxu1  ;;  %v4369_v62 = vld [vmem:[#allocation9_spill] sm:$0xff]  ;;  %v4371_v12 = vld [vmem:[#allocation11_spill] sm:$0xff] }
 0x117   :  { %v876_v51 = vadd.f32 %v2927_v32, %v4365_v50  ;;  %v1036_v52 = vadd.f32 %v2975_v33, %v4366_v47  ;;  %v871_v42 = vadd.f32 %v870_v14, %v4367_v15  ;;  %v1031_v25 = vadd.f32 %v1030_v39, %v4368_v45  ;;  %2666 = vmatprep.subr.bf16.mxu1 %v1262_v31  ;;  %v4372_v31 = vld [vmem:[#allocation12_spill] sm:$0xff] }
 0x118   :  { %2778 = vmatprep.subr.bf16.mxu0 %v1278_v44  ;;  %v2930_v19 = vpop.f32.mrb[28].mxu0  ;;  %v2978_v38 = vpop.f32.mrb[28].mxu1  ;;  %v1263_v26 = vpack.c.bf16 %v1148_v13, %v1147_v29  ;;  %v1279_v7 = vpack.c.bf16 %v1180_v30, %v1179_v41  ;;  %v2988_v47 = vld [vmem:[%s4352_s3] ss:$16 sps:$4 sm:$0xff]   ;;  %v3003_v15 = vld [vmem:[%s4352_s3 + $0x4c] ss:$16 sps:$4 sm:$0xff]  }
 0x119   :  { %v1086_v16 = vmul.f32 0.2, %v876_v51  ;;  %v1118_v63 = vmul.f32 0.2, %v1036_v52  ;;  %v1085_v20 = vmul.f32 0.2, %v871_v42  ;;  %v886_v40 = vadd.f32 %v2930_v19, %v4369_v62 }
 0x11a   :  { %v1117_v48 = vmul.f32 0.2, %v1031_v25  ;;  %2667 = vmatpush3.bf16.msra.mxu1 %v3918_v36  ;;  %2779 = vmatpush3.bf16.msra.mxu0 %v3920_v22  ;;  %v1046_v0 = vadd.f32 %v2978_v38, %v3872_v49  ;;  %v880_v8 = vpop.f32.mrb[29].mxu0  ;;  %v1040_v56 = vpop.f32.mrb[29].mxu1  ;;  %v3005_v45 = vld [vmem:[%s4352_s3 + $0x48] ss:$16 sps:$4 sm:$0xff]  }
 0x11b   :  { %v1150_v57 = vmax.f32 %v876_v51, %v1086_v16  ;;  %v1182_v1 = vmax.f32 %v1036_v52, %v1118_v63  ;;  %v1149_v21 = vmax.f32 %v871_v42, %v1085_v20  ;;  %v1088_v37 = vmul.f32 0.2, %v886_v40  ;;  %2668 = vmatprep.subr.bf16.mxu1 %v1263_v26  ;;  %2780 = vmatprep.subr.bf16.mxu0 %v1279_v7  ;;  %v2996_v52 = vld [vmem:[%s4352_s3 + $0x20] ss:$16 sps:$4 sm:$0xff]   ;;  %v3009_v19 = vld [vmem:[%s4352_s3 + $0x6c] ss:$16 sps:$4 sm:$0xff]  }
 0x11c   :  { %v1181_v43 = vmax.f32 %v1031_v25, %v1117_v48  ;;  %v1120_v18 = vmul.f32 0.2, %v1046_v0  ;;  %v881_v5 = vadd.f32 %v880_v8, %v4370_v58  ;;  %v1041_v34 = vadd.f32 %v1040_v56, %v3874_v17  ;;  %v2933_v2 = vpop.f32.mrb[30].mxu0  ;;  %v2981_v36 = vpop.f32.mrb[30].mxu1  ;;  %v3002_v42 = vld [vmem:[%s4352_s3 + $0x40] ss:$16 sps:$4 sm:$0xff]  }
 0x11d   :  { %v1152_v9 = vmax.f32 %v886_v40, %v1088_v37  ;;  %v896_v22 = vadd.f32 %v2933_v2, %v3908_v11  ;;  %v1056_v49 = vadd.f32 %v2981_v36, %v3940_v61  ;;  %v890_v23 = vpop.f32.mrb[31].mxu0  ;;  %v1050_v24 = vpop.f32.mrb[31].mxu1  ;;  %v1264_v46 = vpack.c.bf16 %v1150_v57, %v1149_v21  ;;  %v3006_v25 = vld [vmem:[%s4352_s3 + $0x64] ss:$16 sps:$4 sm:$0xff]   ;;  %v3008_v38 = vld [vmem:[%s4352_s3 + $0x60] ss:$16 sps:$4 sm:$0xff]  }
 0x11e   :  { %v1184_v59 = vmax.f32 %v1046_v0, %v1120_v18  ;;  %v1087_v6 = vmul.f32 0.2, %v881_v5  ;;  %v1119_v27 = vmul.f32 0.2, %v1041_v34  ;;  %2669 = vmatpush3.bf16.msra.mxu1 %v3932_v53  ;;  %2781 = vmatpush3.bf16.msra.mxu0 %v3934_v54  ;;  %v891_v60 = vadd.f32 %v890_v23, %v4371_v12  ;;  %v4373_v53 = vld [vmem:[#allocation13_spill] sm:$0xff] }
 0x11f   :  { %v1090_v17 = vmul.f32 0.2, %v896_v22  ;;  %v1122_v28 = vmul.f32 0.2, %v1056_v49  ;;  %v1051_v13 = vadd.f32 %v1050_v24, %v4372_v31  ;;  %2670 = vmatprep.subr.bf16.mxu1 %v1264_v46  ;;  %v1280_v11 = vpack.c.bf16 %v1182_v1, %v1181_v43  ;;  %v3011_v26 = vld [vmem:[%s4352_s3 + $0x68] ss:$16 sps:$4 sm:$0xff]  }
 0x120   :  { %v1151_v32 = vmax.f32 %v881_v5, %v1087_v6  ;;  %v1183_v61 = vmax.f32 %v1041_v34, %v1119_v27  ;;  %v1089_v33 = vmul.f32 0.2, %v891_v60  ;;  %v3012_v7 = vld [vmem:[%s4352_s3 + $0x84] ss:$16 sps:$4 sm:$0xff]   ;;  %v3015_v16 = vld [vmem:[%s4352_s3 + $0x8c] ss:$16 sps:$4 sm:$0xff]  }
 0x121   :  { %v1154_v44 = vmax.f32 %v896_v22, %v1090_v17  ;;  %v1186_v30 = vmax.f32 %v1056_v49, %v1122_v28  ;;  %v1121_v29 = vmul.f32 0.2, %v1051_v13  ;;  %2782 = vmatprep.subr.bf16.mxu0 %v1280_v11  ;;  %v3014_v63 = vld [vmem:[%s4352_s3 + $0x80] ss:$16 sps:$4 sm:$0xff]   ;;  %v3017_v20 = vld [vmem:[%s4352_s3 + $0x88] ss:$16 sps:$4 sm:$0xff]  }
 0x122   :  { %v1153_v41 = vmax.f32 %v891_v60, %v1089_v33  ;;  %2671 = vmatpush3.bf16.msra.mxu1 %v3950_v55  ;;  %2783 = vmatpush3.bf16.msra.mxu0 %v4373_v53  ;;  %v1265_v54 = vpack.c.bf16 %v1152_v9, %v1151_v32  ;;  %v1281_v14 = vpack.c.bf16 %v1184_v59, %v1183_v61  ;;  %v2991_v55 = vld [vmem:[%s4352_s3 + $0x8] ss:$16 sps:$4 sm:$0xff]   ;;  %v3018_v62 = vld [vmem:[%s4352_s3 + $0xa4] ss:$16 sps:$4 sm:$0xff]   ;;  %v3021_v40 = vld [vmem:[%s4352_s3 + $0xac] ss:$16 sps:$4 sm:$0xff]  }
 0x123   :  { %v1185_v39 = vmax.f32 %v1051_v13, %v1121_v29  ;;  %v3020_v48 = vld [vmem:[%s4352_s3 + $0xa0] ss:$16 sps:$4 sm:$0xff]   ;;  %v3023_v0 = vld [vmem:[%s4352_s3 + $0xa8] ss:$16 sps:$4 sm:$0xff]   ;;  %v3024_v8 = vld [vmem:[%s4352_s3 + $0xc4] ss:$16 sps:$4 sm:$0xff]  }
 0x124   :  { %2672 = vmatprep.subr.bf16.mxu1 %v1265_v54  ;;  %2784 = vmatprep.subr.bf16.mxu0 %v1281_v14  ;;  %v1266_v50 = vpack.c.bf16 %v1154_v44, %v1153_v41  ;;  %v3027_v56 = vld [vmem:[%s4352_s3 + $0xcc] ss:$16 sps:$4 sm:$0xff]   ;;  %v3026_v57 = vld [vmem:[%s4352_s3 + $0xc0] ss:$16 sps:$4 sm:$0xff]   ;;  %v3029_v1 = vld [vmem:[%s4352_s3 + $0xc8] ss:$16 sps:$4 sm:$0xff]  }
 0x125   :  { %v1282_v51 = vpack.c.bf16 %v1186_v30, %v1185_v39  ;;  %v3030_v21 = vld [vmem:[%s4352_s3 + $0xe4] ss:$16 sps:$4 sm:$0xff]   ;;  %v3033_v37 = vld [vmem:[%s4352_s3 + $0xec] ss:$16 sps:$4 sm:$0xff]   ;;  %v3032_v43 = vld [vmem:[%s4352_s3 + $0xe0] ss:$16 sps:$4 sm:$0xff]  }
 0x126   :  { %2673 = vmatpush3.bf16.msra.mxu1 %v3954_v35  ;;  %2785 = vmatpush3.bf16.msra.mxu0 %v3956_v10  ;;  %v2994_v35 = vld [vmem:[%s4352_s3 + $0x24] ss:$16 sps:$4 sm:$0xff]   ;;  %v2997_v10 = vld [vmem:[%s4352_s3 + $0x2c] ss:$16 sps:$4 sm:$0xff]   ;;  %v3035_v18 = vld [vmem:[%s4352_s3 + $0xe8] ss:$16 sps:$4 sm:$0xff]  }
 0x127   :  { %2674 = vmatprep.subr.bf16.mxu1 %v1266_v50  ;;  %2786 = vmatprep.subr.bf16.mxu0 %v1282_v51  ;;  %v3036_v58 = vld [vmem:[%s4352_s3 + $0x104] ss:$16 sps:$4 sm:$0xff]   ;;  %v3039_v5 = vld [vmem:[%s4352_s3 + $0x10c] ss:$16 sps:$4 sm:$0xff]   ;;  %v3038_v34 = vld [vmem:[%s4352_s3 + $0x100] ss:$16 sps:$4 sm:$0xff]   ;;  %v1318_v50 = vpop.permute.xlu0 %1317  ;;  %v1323_v51 = vpop.permute.xlu1 %1322 }
 0x128   :  { %v3041_v2 = vld [vmem:[%s4352_s3 + $0x108] ss:$16 sps:$4 sm:$0xff]   ;;  %v3042_v36 = vld [vmem:[%s4352_s3 + $0x124] ss:$16 sps:$4 sm:$0xff]   ;;  %v3045_v9 = vld [vmem:[%s4352_s3 + $0x12c] ss:$16 sps:$4 sm:$0xff]  }
 0x129   :  { %v3044_v22 = vld [vmem:[%s4352_s3 + $0x120] ss:$16 sps:$4 sm:$0xff]   ;;  %v3047_v49 = vld [vmem:[%s4352_s3 + $0x128] ss:$16 sps:$4 sm:$0xff]   ;;  %v3048_v23 = vld [vmem:[%s4352_s3 + $0x144] ss:$16 sps:$4 sm:$0xff]  }
 0x12a   :  { %2675 = vmatpush3.bf16.msra.mxu1 %v3962_v3  ;;  %2787 = vmatpush3.bf16.msra.mxu0 %v3964_v4  ;;  %v2999_v3 = vld [vmem:[%s4352_s3 + $0x28] ss:$16 sps:$4 sm:$0xff]   ;;  %v3000_v4 = vld [vmem:[%s4352_s3 + $0x44] ss:$16 sps:$4 sm:$0xff]   ;;  %v3051_v24 = vld [vmem:[%s4352_s3 + $0x14c] ss:$16 sps:$4 sm:$0xff]  }
 0x12b   :  { %v3050_v46 = vld [vmem:[%s4352_s3 + $0x140] ss:$16 sps:$4 sm:$0xff]   ;;  %v3053_v59 = vld [vmem:[%s4352_s3 + $0x148] ss:$16 sps:$4 sm:$0xff]   ;;  %v3054_v6 = vld [vmem:[%s4352_s3 + $0x164] ss:$16 sps:$4 sm:$0xff]  }
 0x12c   :  { %v3057_v27 = vld [vmem:[%s4352_s3 + $0x16c] ss:$16 sps:$4 sm:$0xff]   ;;  %v3056_v12 = vld [vmem:[%s4352_s3 + $0x160] ss:$16 sps:$4 sm:$0xff]   ;;  %v3059_v60 = vld [vmem:[%s4352_s3 + $0x168] ss:$16 sps:$4 sm:$0xff]  }
 0x12d   :  { %1828 = vmatmul.mubr.bf16.vlgmr.msra.gmra.mrb[32].mxu1 %v2988_v47  ;;  %1989 = vmatmul.mubr.bf16.vlgmr.msra.gmra.mrb[32].mxu0 %v2991_v55  ;;  %v3060_v17 = vld [vmem:[%s4352_s3 + $0x184] ss:$16 sps:$4 sm:$0xff]   ;;  %v3063_v28 = vld [vmem:[%s4352_s3 + $0x18c] ss:$16 sps:$4 sm:$0xff]   ;;  %v3062_v31 = vld [vmem:[%s4352_s3 + $0x180] ss:$16 sps:$4 sm:$0xff]   ;;  %v1328_v47 = vpop.permute.xlu0 %1327  ;;  %v4196_v55 = vpop.permute.xlu1 %1332 }
 0x12e   :  { %1835 = vmatprep.mubr.bf16.mxu1 %v2994_v35  ;;  %1996 = vmatprep.mubr.bf16.mxu0 %v2997_v10  ;;  %v3065_v13 = vld [vmem:[%s4352_s3 + $0x188] ss:$16 sps:$4 sm:$0xff]   ;;  %v3066_v11 = vld [vmem:[%s4352_s3 + $0x1a4] ss:$16 sps:$4 sm:$0xff]   ;;  %v3069_v32 = vld [vmem:[%s4352_s3 + $0x1ac] ss:$16 sps:$4 sm:$0xff]  }
 0x12f   :  { %v3068_v61 = vld [vmem:[%s4352_s3 + $0x1a0] ss:$16 sps:$4 sm:$0xff]   ;;  %v3071_v33 = vld [vmem:[%s4352_s3 + $0x1a8] ss:$16 sps:$4 sm:$0xff]   ;;  %v3072_v44 = vld [vmem:[%s4352_s3 + $0x1c4] ss:$16 sps:$4 sm:$0xff]  }
 0x130   :  { %v3075_v30 = vld [vmem:[%s4352_s3 + $0x1cc] ss:$16 sps:$4 sm:$0xff]   ;;  %v3074_v29 = vld [vmem:[%s4352_s3 + $0x1c0] ss:$16 sps:$4 sm:$0xff]   ;;  %v3077_v41 = vld [vmem:[%s4352_s3 + $0x1c8] ss:$16 sps:$4 sm:$0xff]  }
 0x131   :  { %v3078_v53 = vld [vmem:[%s4352_s3 + $0x1e4] ss:$16 sps:$4 sm:$0xff]   ;;  %v3081_v54 = vld [vmem:[%s4352_s3 + $0x1ec] ss:$16 sps:$4 sm:$0xff]   ;;  %v3080_v14 = vld [vmem:[%s4352_s3 + $0x1e0] ss:$16 sps:$4 sm:$0xff]   ;;  %v4198_v35 = vpop.permute.xlu0 %1337  ;;  %v4200_v10 = vpop.permute.xlu1 %1342 }
 0x132   :  { %v3083_v39 = vld [vmem:[%s4352_s3 + $0x1e8] ss:$16 sps:$4 sm:$0xff]  }
 0x135   :  { %1836 = vmatmul.mubr.bf16.gmra.mrb[36].mxu1 %v2996_v52  ;;  %1997 = vmatmul.mubr.bf16.gmra.mrb[36].mxu0 %v2999_v3  ;;  %v4202_v52 = vpop.permute.xlu0 %1347  ;;  %v4204_v3 = vpop.permute.xlu1 %1352 }
 0x136   :  { %1843 = vmatprep.mubr.bf16.mxu1 %v3000_v4  ;;  %2004 = vmatprep.mubr.bf16.mxu0 %v3003_v15 }
 0x139   :  { %v4206_v4 = vpop.permute.xlu0 %1357  ;;  %v4208_v15 = vpop.permute.xlu1 %1362 }
 0x13d   :  { %1844 = vmatmul.mubr.bf16.gmra.mrb[40].mxu1 %v3002_v42  ;;  %2005 = vmatmul.mubr.bf16.gmra.mrb[40].mxu0 %v3005_v45  ;;  %v4210_v42 = vpop.permute.xlu0 %1367  ;;  %v4212_v45 = vpop.permute.xlu1 %1372 }
 0x13e   :  { %1851 = vmatprep.mubr.bf16.mxu1 %v3006_v25  ;;  %2012 = vmatprep.mubr.bf16.mxu0 %v3009_v19 }
 0x141   :  { %v4214_v25 = vpop.permute.xlu0 %1377  ;;  %v4216_v19 = vpop.permute.xlu1 %1382 }
 0x145   :  { %1852 = vmatmul.mubr.bf16.gmra.mrb[44].mxu1 %v3008_v38  ;;  %2013 = vmatmul.mubr.bf16.gmra.mrb[44].mxu0 %v3011_v26  ;;  %v4218_v38 = vpop.permute.xlu0 %1387  ;;  %v4220_v26 = vpop.permute.xlu1 %1392 }
 0x146   :  { %1859 = vmatprep.mubr.bf16.mxu1 %v3012_v7  ;;  %2020 = vmatprep.mubr.bf16.mxu0 %v3015_v16 }
 0x149   :  { %v4222_v7 = vpop.permute.xlu0 %1397  ;;  %v4224_v16 = vpop.permute.xlu1 %1402 }
 0x14d   :  { %1860 = vmatmul.mubr.bf16.gmra.mrb[48].mxu1 %v3014_v63  ;;  %2021 = vmatmul.mubr.bf16.gmra.mrb[48].mxu0 %v3017_v20  ;;  %v4226_v63 = vpop.permute.xlu0 %1407  ;;  %v4228_v20 = vpop.permute.xlu1 %1412 }
 0x14e   :  { %1867 = vmatprep.mubr.bf16.mxu1 %v3018_v62  ;;  %2028 = vmatprep.mubr.bf16.mxu0 %v3021_v40 }
 0x151   :  { %v4230_v62 = vpop.permute.xlu0 %1417  ;;  %v2216_v40 = vpop.permute.xlu1 %2215 }
 0x155   :  { %1868 = vmatmul.mubr.bf16.gmra.mrb[52].mxu1 %v3020_v48  ;;  %2029 = vmatmul.mubr.bf16.gmra.mrb[52].mxu0 %v3023_v0  ;;  %v2221_v48 = vpop.permute.xlu0 %2220  ;;  %v4232_v0 = vpop.permute.xlu1 %2225 }
 0x156   :  { %1875 = vmatprep.mubr.bf16.mxu1 %v3024_v8  ;;  %2036 = vmatprep.mubr.bf16.mxu0 %v3027_v56 }
 0x159   :  { %v4234_v8 = vpop.permute.xlu0 %2230  ;;  %v4236_v56 = vpop.permute.xlu1 %2235 }
 0x15d   :  { %1876 = vmatmul.mubr.bf16.gmra.mrb[56].mxu1 %v3026_v57  ;;  %2037 = vmatmul.mubr.bf16.gmra.mrb[56].mxu0 %v3029_v1  ;;  %v4238_v57 = vpop.permute.xlu0 %2240  ;;  %v4240_v1 = vpop.permute.xlu1 %2245 }
 0x15e   :  { %1883 = vmatprep.mubr.bf16.mxu1 %v3030_v21  ;;  %2044 = vmatprep.mubr.bf16.mxu0 %v3033_v37 }
 0x161   :  { %v4242_v21 = vpop.permute.xlu0 %2250  ;;  %v4244_v37 = vpop.permute.xlu1 %2255 }
 0x165   :  { %1884 = vmatmul.mubr.bf16.gmra.mrb[60].mxu1 %v3032_v43  ;;  %2045 = vmatmul.mubr.bf16.gmra.mrb[60].mxu0 %v3035_v18  ;;  %v4246_v43 = vpop.permute.xlu0 %2260 }
 0x166   :  { %1891 = vmatprep.mubr.bf16.mxu1 %v3036_v58  ;;  %2052 = vmatprep.mubr.bf16.mxu0 %v3039_v5 }
 0x16d   :  { %1892 = vmatmul.mubr.bf16.gmra.mrb[64].mxu1 %v3038_v34  ;;  %2053 = vmatmul.mubr.bf16.gmra.mrb[64].mxu0 %v3041_v2 }
 0x16e   :  { %1899 = vmatprep.mubr.bf16.mxu1 %v3042_v36  ;;  %2060 = vmatprep.mubr.bf16.mxu0 %v3045_v9 }
 0x175   :  { %1900 = vmatmul.mubr.bf16.gmra.mrb[68].mxu1 %v3044_v22  ;;  %2061 = vmatmul.mubr.bf16.gmra.mrb[68].mxu0 %v3047_v49 }
 0x176   :  { %1907 = vmatprep.mubr.bf16.mxu1 %v3048_v23  ;;  %2068 = vmatprep.mubr.bf16.mxu0 %v3051_v24 }
 0x17d   :  { %1908 = vmatmul.mubr.bf16.gmra.mrb[72].mxu1 %v3050_v46  ;;  %2069 = vmatmul.mubr.bf16.gmra.mrb[72].mxu0 %v3053_v59 }
 0x17e   :  { %1915 = vmatprep.mubr.bf16.mxu1 %v3054_v6  ;;  %2076 = vmatprep.mubr.bf16.mxu0 %v3057_v27 }
 0x185   :  { %1916 = vmatmul.mubr.bf16.gmra.mrb[76].mxu1 %v3056_v12  ;;  %2077 = vmatmul.mubr.bf16.gmra.mrb[76].mxu0 %v3059_v60  ;;  %v4248_v12 = vpop.permute.xlu1 %2265  ;;  %v4250_v60 = vpop.permute.xlu0 %2270 }
 0x186   :  { %1923 = vmatprep.mubr.bf16.mxu1 %v3060_v17  ;;  %2084 = vmatprep.mubr.bf16.mxu0 %v3063_v28 }
 0x18d   :  { %1924 = vmatmul.mubr.bf16.gmra.mrb[80].mxu1 %v3062_v31  ;;  %2085 = vmatmul.mubr.bf16.gmra.mrb[80].mxu0 %v3065_v13 }
 0x18e   :  { %1931 = vmatprep.mubr.bf16.mxu1 %v3066_v11  ;;  %2092 = vmatprep.mubr.bf16.mxu0 %v3069_v32 }
 0x195   :  { %1932 = vmatmul.mubr.bf16.gmra.mrb[84].mxu1 %v3068_v61  ;;  %2093 = vmatmul.mubr.bf16.gmra.mrb[84].mxu0 %v3071_v33 }
 0x196   :  { %1939 = vmatprep.mubr.bf16.mxu1 %v3072_v44  ;;  %2100 = vmatprep.mubr.bf16.mxu0 %v3075_v30 }
 0x19d   :  { %1940 = vmatmul.mubr.bf16.gmra.mrb[88].mxu1 %v3074_v29  ;;  %2101 = vmatmul.mubr.bf16.gmra.mrb[88].mxu0 %v3077_v41 }
 0x19e   :  { %1947 = vmatprep.mubr.bf16.mxu1 %v3078_v53  ;;  %2108 = vmatprep.mubr.bf16.mxu0 %v3081_v54 }
 0x1a5   :  { %1948 = vmatmul.mubr.bf16.gmra.mrb[92].mxu1 %v3080_v14  ;;  %2109 = vmatmul.mubr.bf16.gmra.mrb[92].mxu0 %v3083_v39 }
 0x200   :  { %v2676_v18 = vpop.f32.mrb[32].mxu1  ;;  %v2788_v58 = vpop.f32.mrb[32].mxu0 }
 0x201   :  { %v2677_v5 = vpop.f32.mrb[33].mxu1  ;;  %v2789_v34 = vpop.f32.mrb[33].mxu0 }
 0x202   :  { %v2678_v2 = vadd.f32 %v2677_v5, %v2676_v18  ;;  %v2679_v36 = vpop.f32.mrb[34].mxu1  ;;  %v2790_v9 = vadd.f32 %v2789_v34, %v2788_v58  ;;  %v2791_v22 = vpop.f32.mrb[34].mxu0 }
 0x203   :  { %v2680_v49 = vpop.f32.mrb[35].mxu1  ;;  %v2792_v23 = vpop.f32.mrb[35].mxu0 }
 0x204   :  { %v1830_v24 = vadd.f32 %v2678_v2, %v1318_v50  ;;  %v2681_v46 = vadd.f32 %v2680_v49, %v2679_v36  ;;  %v2793_v59 = vadd.f32 %v2792_v23, %v2791_v22  ;;  %v4253_v2 = vpop.permute.xlu1 %2275  ;;  %v4255_v36 = vpop.permute.xlu0 %2280 }
 0x206   :  { %v1833_v6 = vadd.f32 %v2681_v46, %v1323_v51  ;;  %v1991_v27 = vadd.f32 %v2790_v9, %v1830_v24 }
 0x208   :  { %v2117_v17 = vmul.f32 0.2, %v1991_v27  ;;  %v1994_v28 = vadd.f32 %v2793_v59, %v1833_v6  ;;  %v2682_v31 = vpop.f32.mrb[36].mxu1  ;;  %v2794_v13 = vpop.f32.mrb[36].mxu0 }
 0x209   :  { %v2683_v11 = vpop.f32.mrb[37].mxu1  ;;  %v2795_v32 = vpop.f32.mrb[37].mxu0 }
 0x20a   :  { %v2149_v61 = vmax.f32 %v1991_v27, %v2117_v17  ;;  %v2118_v33 = vmul.f32 0.2, %v1994_v28  ;;  %v2684_v44 = vadd.f32 %v2683_v11, %v2682_v31  ;;  %v2685_v30 = vpop.f32.mrb[38].mxu1  ;;  %v2796_v29 = vadd.f32 %v2795_v32, %v2794_v13  ;;  %v2797_v41 = vpop.f32.mrb[38].mxu0 }
 0x20b   :  { %v2686_v53 = vpop.f32.mrb[39].mxu1  ;;  %v2798_v54 = vpop.f32.mrb[39].mxu0 }
 0x20c   :  { %v2150_v14 = vmax.f32 %v1994_v28, %v2118_v33  ;;  %v1838_v39 = vadd.f32 %v2684_v44, %v1328_v47  ;;  %v2687_v50 = vadd.f32 %v2686_v53, %v2685_v30  ;;  %v2799_v51 = vadd.f32 %v2798_v54, %v2797_v41  ;;  %v4261_v41 = vpop.permute.xlu1 %2285  ;;  %v4263_v53 = vpop.permute.xlu0 %2290 }
 0x20d   :  { %v2373_v18 = vmul.f32 %v2216_v40, %v2149_v61 }
 0x20e   :  { %v2374_v58 = vmul.f32 %v2221_v48, %v2150_v14  ;;  %v1841_v5 = vadd.f32 %v2687_v50, %v4196_v55  ;;  %v1999_v34 = vadd.f32 %v2796_v29, %v1838_v39 }
 0x210   :  { %v2405_v9 = vadd.f32 %v2374_v58, %v2373_v18  ;;  %v2119_v22 = vmul.f32 0.2, %v1999_v34  ;;  %v2002_v49 = vadd.f32 %v2799_v51, %v1841_v5  ;;  %v2688_v23 = vpop.f32.mrb[40].mxu1  ;;  %v2800_v24 = vpop.f32.mrb[40].mxu0 }
 0x211   :  { %v2689_v46 = vpop.f32.mrb[41].mxu1  ;;  %v2801_v59 = vpop.f32.mrb[41].mxu0 }
 0x212   :  { %v2151_v6 = vmax.f32 %v1999_v34, %v2119_v22  ;;  %v2120_v47 = vmul.f32 0.2, %v2002_v49  ;;  %v2690_v27 = vadd.f32 %v2689_v46, %v2688_v23  ;;  %v2691_v17 = vpop.f32.mrb[42].mxu1  ;;  %v2802_v40 = vadd.f32 %v2801_v59, %v2800_v24  ;;  %v2803_v48 = vpop.f32.mrb[42].mxu0 }
 0x213   :  { %v2692_v28 = vpop.f32.mrb[43].mxu1  ;;  %v2804_v55 = vpop.f32.mrb[43].mxu0 }
 0x214   :  { %v2375_v31 = vmul.f32 %v4232_v0, %v2151_v6  ;;  %v2152_v13 = vmax.f32 %v2002_v49, %v2120_v47  ;;  %v1846_v11 = vadd.f32 %v2690_v27, %v4198_v35  ;;  %v2693_v32 = vadd.f32 %v2692_v28, %v2691_v17 }
 0x215   :  { %v2805_v61 = vadd.f32 %v2804_v55, %v2803_v48  ;;  %v4271_v48 = vpop.permute.xlu0 %1422 }
 0x216   :  { %v2406_v33 = vadd.f32 %v2405_v9, %v2375_v31  ;;  %v2376_v44 = vmul.f32 %v4234_v8, %v2152_v13  ;;  %v1849_v30 = vadd.f32 %v2693_v32, %v4200_v10  ;;  %v2007_v29 = vadd.f32 %v2802_v40, %v1846_v11  ;;  %v4269_v40 = vpop.permute.xlu1 %2295 }
 0x218   :  { %v2407_v54 = vadd.f32 %v2406_v33, %v2376_v44  ;;  %v2121_v14 = vmul.f32 0.2, %v2007_v29  ;;  %v2010_v39 = vadd.f32 %v2805_v61, %v1849_v30  ;;  %v2694_v50 = vpop.f32.mrb[44].mxu1  ;;  %v2806_v0 = vpop.f32.mrb[44].mxu0 }
 0x219   :  { %v2695_v51 = vpop.f32.mrb[45].mxu1  ;;  %v2807_v18 = vpop.f32.mrb[45].mxu0 }
 0x21a   :  { %v2153_v35 = vmax.f32 %v2007_v29, %v2121_v14  ;;  %v2122_v58 = vmul.f32 0.2, %v2010_v39  ;;  %v2696_v5 = vadd.f32 %v2695_v51, %v2694_v50  ;;  %v2697_v34 = vpop.f32.mrb[46].mxu1  ;;  %v2808_v9 = vadd.f32 %v2807_v18, %v2806_v0  ;;  %v2809_v8 = vpop.f32.mrb[46].mxu0 }
 0x21b   :  { %v2698_v22 = vpop.f32.mrb[47].mxu1  ;;  %v2810_v10 = vpop.f32.mrb[47].mxu0 }
 0x21c   :  { %v2377_v49 = vmul.f32 %v4236_v56, %v2153_v35  ;;  %v2154_v23 = vmax.f32 %v2010_v39, %v2122_v58  ;;  %v1854_v24 = vadd.f32 %v2696_v5, %v4202_v52  ;;  %v2699_v46 = vadd.f32 %v2698_v22, %v2697_v34  ;;  %v4277_v5 = vpop.permute.xlu1 %2300  ;;  %v4279_v34 = vpop.permute.xlu0 %1427 }
 0x21d   :  { %v2811_v59 = vadd.f32 %v2810_v10, %v2809_v8 }
 0x21e   :  { %v2408_v6 = vadd.f32 %v2407_v54, %v2377_v49  ;;  %v2378_v47 = vmul.f32 %v4238_v57, %v2154_v23  ;;  %v1857_v27 = vadd.f32 %v2699_v46, %v4204_v3  ;;  %v2015_v17 = vadd.f32 %v2808_v9, %v1854_v24 }
 0x220   :  { %v2409_v28 = vadd.f32 %v2408_v6, %v2378_v47  ;;  %v2123_v55 = vmul.f32 0.2, %v2015_v17  ;;  %v2018_v31 = vadd.f32 %v2811_v59, %v1857_v27  ;;  %v2700_v13 = vpop.f32.mrb[48].mxu1  ;;  %v2812_v56 = vpop.f32.mrb[48].mxu0 }
 0x221   :  { %v2701_v11 = vpop.f32.mrb[49].mxu1  ;;  %v2813_v32 = vpop.f32.mrb[49].mxu0 }
 0x222   :  { %v2155_v52 = vmax.f32 %v2015_v17, %v2123_v55  ;;  %v2124_v61 = vmul.f32 0.2, %v2018_v31  ;;  %v2702_v33 = vadd.f32 %v2701_v11, %v2700_v13  ;;  %v2703_v44 = vpop.f32.mrb[50].mxu1  ;;  %v2814_v30 = vadd.f32 %v2813_v32, %v2812_v56  ;;  %v2815_v57 = vpop.f32.mrb[50].mxu0 }
 0x223   :  { %v2704_v29 = vpop.f32.mrb[51].mxu1  ;;  %v2816_v3 = vpop.f32.mrb[51].mxu0 }
 0x224   :  { %v2379_v54 = vmul.f32 %v4240_v1, %v2155_v52  ;;  %v2156_v14 = vmax.f32 %v2018_v31, %v2124_v61  ;;  %v1862_v39 = vadd.f32 %v2702_v33, %v4206_v4  ;;  %v2705_v50 = vadd.f32 %v2704_v29, %v2703_v44  ;;  %v4285_v52 = vpop.permute.xlu1 %2305  ;;  %v4287_v61 = vpop.permute.xlu0 %1432 }
 0x225   :  { %v2817_v0 = vadd.f32 %v2816_v3, %v2815_v57 }
 0x226   :  { %v2410_v51 = vadd.f32 %v2409_v28, %v2379_v54  ;;  %v2380_v18 = vmul.f32 %v4242_v21, %v2156_v14  ;;  %v1865_v35 = vadd.f32 %v2705_v50, %v4208_v15  ;;  %v2023_v58 = vadd.f32 %v2814_v30, %v1862_v39 }
 0x228   :  { %v2411_v9 = vadd.f32 %v2410_v51, %v2380_v18  ;;  %v2125_v8 = vmul.f32 0.2, %v2023_v58  ;;  %v2026_v22 = vadd.f32 %v2817_v0, %v1865_v35  ;;  %v2706_v10 = vpop.f32.mrb[52].mxu1  ;;  %v2818_v1 = vpop.f32.mrb[52].mxu0 }
 0x229   :  { %v2707_v49 = vpop.f32.mrb[53].mxu1  ;;  %v2819_v23 = vpop.f32.mrb[53].mxu0 }
 0x22a   :  { %v2157_v4 = vmax.f32 %v2023_v58, %v2125_v8  ;;  %v2126_v24 = vmul.f32 0.2, %v2026_v22  ;;  %v2708_v46 = vadd.f32 %v2707_v49, %v2706_v10  ;;  %v2709_v59 = vpop.f32.mrb[54].mxu1  ;;  %v2820_v6 = vadd.f32 %v2819_v23, %v2818_v1  ;;  %v2821_v21 = vpop.f32.mrb[54].mxu0 }
 0x22b   :  { %v2710_v47 = vpop.f32.mrb[55].mxu1  ;;  %v2822_v15 = vpop.f32.mrb[55].mxu0 }
 0x22c   :  { %v2381_v27 = vmul.f32 %v4244_v37, %v2157_v4  ;;  %v2158_v17 = vmax.f32 %v2026_v22, %v2126_v24  ;;  %v1870_v28 = vadd.f32 %v2708_v46, %v4210_v42  ;;  %v2711_v55 = vadd.f32 %v2710_v47, %v2709_v59  ;;  %v4293_v49 = vpop.permute.xlu1 %2310  ;;  %v4295_v23 = vpop.permute.xlu0 %1437 }
 0x22d   :  { %v2823_v31 = vadd.f32 %v2822_v15, %v2821_v21 }
 0x22e   :  { %v2412_v13 = vadd.f32 %v2411_v9, %v2381_v27  ;;  %v2382_v56 = vmul.f32 %v4246_v43, %v2158_v17  ;;  %v1873_v11 = vadd.f32 %v2711_v55, %v4212_v45  ;;  %v2031_v32 = vadd.f32 %v2820_v6, %v1870_v28 }
 0x230   :  { %v2413_v33 = vadd.f32 %v2412_v13, %v2382_v56  ;;  %v2127_v44 = vmul.f32 0.2, %v2031_v32  ;;  %v2034_v30 = vadd.f32 %v2823_v31, %v1873_v11  ;;  %v2712_v57 = vpop.f32.mrb[56].mxu1  ;;  %v2824_v37 = vpop.f32.mrb[56].mxu0 }
 0x231   :  { %v2713_v29 = vpop.f32.mrb[57].mxu1  ;;  %v2825_v3 = vpop.f32.mrb[57].mxu0 }
 0x232   :  { %v2159_v42 = vmax.f32 %v2031_v32, %v2127_v44  ;;  %v2128_v54 = vmul.f32 0.2, %v2034_v30  ;;  %v2714_v14 = vadd.f32 %v2713_v29, %v2712_v57  ;;  %v2715_v39 = vpop.f32.mrb[58].mxu1  ;;  %v2826_v50 = vadd.f32 %v2825_v3, %v2824_v37  ;;  %v2827_v43 = vpop.f32.mrb[58].mxu0 }
 0x233   :  { %v2716_v0 = vpop.f32.mrb[59].mxu1  ;;  %v2828_v45 = vpop.f32.mrb[59].mxu0 }
 0x234   :  { %v2383_v51 = vmul.f32 %v4248_v12, %v2159_v42  ;;  %v2160_v18 = vmax.f32 %v2034_v30, %v2128_v54  ;;  %v1878_v35 = vadd.f32 %v2714_v14, %v4214_v25  ;;  %v2717_v58 = vadd.f32 %v2716_v0, %v2715_v39  ;;  %v4301_v57 = vpop.permute.xlu1 %2315  ;;  %v4303_v37 = vpop.permute.xlu0 %1442 }
 0x235   :  { %v2829_v9 = vadd.f32 %v2828_v45, %v2827_v43 }
 0x236   :  { %v2414_v8 = vadd.f32 %v2413_v33, %v2383_v51  ;;  %v2384_v22 = vmul.f32 %v4250_v60, %v2160_v18  ;;  %v1881_v10 = vadd.f32 %v2717_v58, %v4216_v19  ;;  %v2039_v1 = vadd.f32 %v2826_v50, %v1878_v35 }
 0x238   :  { %v2415_v4 = vadd.f32 %v2414_v8, %v2384_v22  ;;  %v2129_v24 = vmul.f32 0.2, %v2039_v1  ;;  %v2042_v46 = vadd.f32 %v2829_v9, %v1881_v10  ;;  %v2718_v59 = vpop.f32.mrb[60].mxu1  ;;  %v2830_v12 = vpop.f32.mrb[60].mxu0 }
 0x239   :  { %v2719_v6 = vpop.f32.mrb[61].mxu1  ;;  %v2831_v21 = vpop.f32.mrb[61].mxu0 }
 0x23a   :  { %v2161_v25 = vmax.f32 %v2039_v1, %v2129_v24  ;;  %v2130_v47 = vmul.f32 0.2, %v2042_v46  ;;  %v2720_v15 = vadd.f32 %v2719_v6, %v2718_v59  ;;  %v2721_v27 = vpop.f32.mrb[62].mxu1  ;;  %v2832_v17 = vadd.f32 %v2831_v21, %v2830_v12  ;;  %v2833_v60 = vpop.f32.mrb[62].mxu0 }
 0x23b   :  { %v2722_v28 = vpop.f32.mrb[63].mxu1  ;;  %v2834_v19 = vpop.f32.mrb[63].mxu0 }
 0x23c   :  { %v2385_v55 = vmul.f32 %v4253_v2, %v2161_v25  ;;  %v2162_v31 = vmax.f32 %v2042_v46, %v2130_v47  ;;  %v1886_v13 = vadd.f32 %v2720_v15, %v4218_v38  ;;  %v2723_v56 = vadd.f32 %v2722_v28, %v2721_v27  ;;  %v4309_v24 = vpop.permute.xlu1 %2320  ;;  %v4311_v46 = vpop.permute.xlu0 %1447 }
 0x23d   :  { %v2835_v11 = vadd.f32 %v2834_v19, %v2833_v60 }
 0x23e   :  { %v2416_v32 = vadd.f32 %v2415_v4, %v2385_v55  ;;  %v2386_v33 = vmul.f32 %v4255_v36, %v2162_v31  ;;  %v1889_v44 = vadd.f32 %v2723_v56, %v4220_v26  ;;  %v2047_v30 = vadd.f32 %v2832_v17, %v1886_v13 }
 0x240   :  { %v2417_v29 = vadd.f32 %v2416_v32, %v2386_v33  ;;  %v2131_v3 = vmul.f32 0.2, %v2047_v30  ;;  %v2050_v42 = vadd.f32 %v2835_v11, %v1889_v44  ;;  %v2724_v54 = vpop.f32.mrb[64].mxu1  ;;  %v2836_v2 = vpop.f32.mrb[64].mxu0 }
 0x241   :  { %v2725_v14 = vpop.f32.mrb[65].mxu1  ;;  %v2837_v39 = vpop.f32.mrb[65].mxu0 }
 0x242   :  { %v2163_v38 = vmax.f32 %v2047_v30, %v2131_v3  ;;  %v2132_v50 = vmul.f32 0.2, %v2050_v42  ;;  %v2726_v43 = vadd.f32 %v2725_v14, %v2724_v54  ;;  %v2727_v0 = vpop.f32.mrb[66].mxu1  ;;  %v2838_v45 = vadd.f32 %v2837_v39, %v2836_v2  ;;  %v2839_v36 = vpop.f32.mrb[66].mxu0 }
 0x243   :  { %v2728_v51 = vpop.f32.mrb[67].mxu1  ;;  %v2840_v26 = vpop.f32.mrb[67].mxu0 }
 0x244   :  { %v2387_v18 = vmul.f32 %v4261_v41, %v2163_v38  ;;  %v2164_v35 = vmax.f32 %v2050_v42, %v2132_v50  ;;  %v1894_v58 = vadd.f32 %v2726_v43, %v4222_v7  ;;  %v2729_v9 = vadd.f32 %v2728_v51, %v2727_v0  ;;  %v4317_v30 = vpop.permute.xlu1 %2325 }
 0x245   :  { %v2841_v8 = vadd.f32 %v2840_v26, %v2839_v36 }
 0x246   :  { %v2418_v22 = vadd.f32 %v2417_v29, %v2387_v18  ;;  %v2388_v10 = vmul.f32 %v4263_v53, %v2164_v35  ;;  %v1897_v1 = vadd.f32 %v2729_v9, %v4224_v16  ;;  %v2055_v4 = vadd.f32 %v2838_v45, %v1894_v58  ;;  %v4319_v29 = vpop.permute.xlu0 %1452 }
 0x248   :  { %v2419_v59 = vadd.f32 %v2418_v22, %v2388_v10  ;;  %v2133_v12 = vmul.f32 0.2, %v2055_v4  ;;  %v2058_v6 = vadd.f32 %v2841_v8, %v1897_v1  ;;  %v2730_v21 = vpop.f32.mrb[68].mxu1  ;;  %v2842_v41 = vpop.f32.mrb[68].mxu0 }
 0x249   :  { %v2731_v25 = vpop.f32.mrb[69].mxu1  ;;  %v2843_v47 = vpop.f32.mrb[69].mxu0 }
 0x24a   :  { %v2165_v7 = vmax.f32 %v2055_v4, %v2133_v12  ;;  %v2134_v15 = vmul.f32 0.2, %v2058_v6  ;;  %v2732_v27 = vadd.f32 %v2731_v25, %v2730_v21  ;;  %v2733_v17 = vpop.f32.mrb[70].mxu1  ;;  %v2844_v60 = vadd.f32 %v2843_v47, %v2842_v41  ;;  %v2845_v53 = vpop.f32.mrb[70].mxu0 }
 0x24b   :  { %v2734_v28 = vpop.f32.mrb[71].mxu1  ;;  %v2846_v16 = vpop.f32.mrb[71].mxu0 }
 0x24c   :  { %v2389_v19 = vmul.f32 %v4269_v40, %v2165_v7  ;;  %v2166_v55 = vmax.f32 %v2058_v6, %v2134_v15  ;;  %v1902_v31 = vadd.f32 %v2732_v27, %v4226_v63  ;;  %v2735_v13 = vadd.f32 %v2734_v28, %v2733_v17  ;;  %v2331_v10 = vpop.permute.xlu1 %2330  ;;  %v4325_v1 = vpop.permute.xlu0 %1457 }
 0x24d   :  { %v2847_v56 = vadd.f32 %v2846_v16, %v2845_v53 }
 0x24e   :  { %v2420_v11 = vadd.f32 %v2419_v59, %v2389_v19  ;;  %v2390_v32 = vmul.f32 %v4277_v5, %v2166_v55  ;;  %v1905_v33 = vadd.f32 %v2735_v13, %v4228_v20  ;;  %v2063_v44 = vadd.f32 %v2844_v60, %v1902_v31 }
 0x250   :  { %v2421_v3 = vadd.f32 %v2420_v11, %v2390_v32  ;;  %v2135_v42 = vmul.f32 0.2, %v2063_v44  ;;  %v2066_v54 = vadd.f32 %v2847_v56, %v1905_v33  ;;  %v2736_v2 = vpop.f32.mrb[72].mxu1  ;;  %v2848_v40 = vpop.f32.mrb[72].mxu0 }
 0x251   :  { %v2737_v14 = vpop.f32.mrb[73].mxu1  ;;  %v2849_v39 = vpop.f32.mrb[73].mxu0 }
 0x252   :  { %v2167_v63 = vmax.f32 %v2063_v44, %v2135_v42  ;;  %v2136_v38 = vmul.f32 0.2, %v2066_v54  ;;  %v2738_v50 = vadd.f32 %v2737_v14, %v2736_v2  ;;  %v2739_v43 = vpop.f32.mrb[74].mxu1  ;;  %v2850_v0 = vadd.f32 %v2849_v39, %v2848_v40  ;;  %v2851_v5 = vpop.f32.mrb[74].mxu0 }
 0x253   :  { %v2740_v45 = vpop.f32.mrb[75].mxu1  ;;  %v2852_v20 = vpop.f32.mrb[75].mxu0 }
 0x254   :  { %v2391_v36 = vmul.f32 %v4285_v52, %v2167_v63  ;;  %v2168_v51 = vmax.f32 %v2066_v54, %v2136_v38  ;;  %v1910_v26 = vadd.f32 %v2738_v50, %v4230_v62  ;;  %v2741_v18 = vadd.f32 %v2740_v45, %v2739_v43  ;;  %v2336_v56 = vpop.permute.xlu1 %2335  ;;  %v4331_v11 = vpop.permute.xlu0 %1462 }
 0x255   :  { %v2853_v35 = vadd.f32 %v2852_v20, %v2851_v5 }
 0x256   :  { %v2422_v58 = vadd.f32 %v2421_v3, %v2391_v36  ;;  %v2392_v9 = vmul.f32 %v4293_v49, %v2168_v51  ;;  %v1913_v8 = vadd.f32 %v2741_v18, %v4271_v48  ;;  %v2071_v22 = vadd.f32 %v2850_v0, %v1910_v26 }
 0x258   :  { %v2423_v4 = vadd.f32 %v2422_v58, %v2392_v9  ;;  %v2137_v59 = vmul.f32 0.2, %v2071_v22  ;;  %v2074_v12 = vadd.f32 %v2853_v35, %v1913_v8  ;;  %v2742_v6 = vpop.f32.mrb[76].mxu1  ;;  %v2854_v21 = vpop.f32.mrb[76].mxu0 }
 0x259   :  { %v2743_v52 = vpop.f32.mrb[77].mxu1  ;;  %v2855_v41 = vpop.f32.mrb[77].mxu0 }
 0x25a   :  { %v2169_v25 = vmax.f32 %v2071_v22, %v2137_v59  ;;  %v2138_v62 = vmul.f32 0.2, %v2074_v12  ;;  %v2744_v47 = vadd.f32 %v2743_v52, %v2742_v6  ;;  %v2745_v7 = vpop.f32.mrb[78].mxu1  ;;  %v2856_v15 = vadd.f32 %v2855_v41, %v2854_v21  ;;  %v2857_v27 = vpop.f32.mrb[78].mxu0 }
 0x25b   :  { %v2746_v49 = vpop.f32.mrb[79].mxu1  ;;  %v2858_v17 = vpop.f32.mrb[79].mxu0 }
 0x25c   :  { %v2393_v48 = vmul.f32 %v4301_v57, %v2169_v25  ;;  %v2170_v60 = vmax.f32 %v2074_v12, %v2138_v62  ;;  %v1918_v53 = vadd.f32 %v2744_v47, %v4279_v34  ;;  %v2747_v28 = vadd.f32 %v2746_v49, %v2745_v7  ;;  %v2341_v26 = vpop.permute.xlu1 %2340  ;;  %v4336_v18 = vpop.permute.xlu0 %1467 }
 0x25d   :  { %v2859_v16 = vadd.f32 %v2858_v17, %v2857_v27 }
 0x25e   :  { %v2424_v19 = vadd.f32 %v2423_v4, %v2393_v48  ;;  %v2394_v55 = vmul.f32 %v4309_v24, %v2170_v60  ;;  %v1921_v31 = vadd.f32 %v2747_v28, %v4287_v61  ;;  %v2079_v13 = vadd.f32 %v2856_v15, %v1918_v53 }
 0x260   :  { %v2425_v32 = vadd.f32 %v2424_v19, %v2394_v55  ;;  %v2139_v33 = vmul.f32 0.2, %v2079_v13  ;;  %v2082_v44 = vadd.f32 %v2859_v16, %v1921_v31  ;;  %v2748_v3 = vpop.f32.mrb[80].mxu1  ;;  %v2860_v42 = vpop.f32.mrb[80].mxu0 }
 0x261   :  { %v2749_v57 = vpop.f32.mrb[81].mxu1  ;;  %v2861_v54 = vpop.f32.mrb[81].mxu0 }
 0x262   :  { %v2171_v2 = vmax.f32 %v2079_v13, %v2139_v33  ;;  %v2140_v34 = vmul.f32 0.2, %v2082_v44  ;;  %v2750_v40 = vadd.f32 %v2749_v57, %v2748_v3  ;;  %v2751_v14 = vpop.f32.mrb[82].mxu1  ;;  %v2862_v39 = vadd.f32 %v2861_v54, %v2860_v42  ;;  %v2863_v63 = vpop.f32.mrb[82].mxu0 }
 0x263   :  { %v2752_v24 = vpop.f32.mrb[83].mxu1  ;;  %v2864_v38 = vpop.f32.mrb[83].mxu0 }
 0x264   :  { %v2395_v61 = vmul.f32 %v4317_v30, %v2171_v2  ;;  %v2172_v50 = vmax.f32 %v2082_v44, %v2140_v34  ;;  %v1926_v43 = vadd.f32 %v2750_v40, %v4295_v23  ;;  %v2753_v0 = vadd.f32 %v2752_v24, %v2751_v14  ;;  %v2346_v48 = vpop.permute.xlu1 %2345  ;;  %v1473_v60 = vpop.permute.xlu0 %1472 }
 0x265   :  { %v2865_v5 = vadd.f32 %v2864_v38, %v2863_v63 }
 0x266   :  { %v2426_v45 = vadd.f32 %v2425_v32, %v2395_v61  ;;  %v2396_v20 = vmul.f32 %v2331_v10, %v2172_v50  ;;  %v1929_v36 = vadd.f32 %v2753_v0, %v4303_v37  ;;  %v2087_v51 = vadd.f32 %v2862_v39, %v1926_v43 }
 0x268   :  { %v2427_v35 = vadd.f32 %v2426_v45, %v2396_v20  ;;  %v2141_v58 = vmul.f32 0.2, %v2087_v51  ;;  %v2090_v9 = vadd.f32 %v2865_v5, %v1929_v36  ;;  %v2754_v8 = vpop.f32.mrb[84].mxu1  ;;  %v2866_v22 = vpop.f32.mrb[84].mxu0 }
 0x269   :  { %v2755_v4 = vpop.f32.mrb[85].mxu1  ;;  %v2867_v30 = vpop.f32.mrb[85].mxu0 }
 0x26a   :  { %v2173_v59 = vmax.f32 %v2087_v51, %v2141_v58  ;;  %v2142_v12 = vmul.f32 0.2, %v2090_v9  ;;  %v2756_v23 = vadd.f32 %v2755_v4, %v2754_v8  ;;  %v2757_v6 = vpop.f32.mrb[86].mxu1  ;;  %v2868_v21 = vadd.f32 %v2867_v30, %v2866_v22  ;;  %v2869_v52 = vpop.f32.mrb[86].mxu0 }
 0x26b   :  { %v2758_v10 = vpop.f32.mrb[87].mxu1  ;;  %v2870_v41 = vpop.f32.mrb[87].mxu0 }
 0x26c   :  { %v2397_v37 = vmul.f32 %v2336_v56, %v2173_v59  ;;  %v2174_v25 = vmax.f32 %v2090_v9, %v2142_v12  ;;  %v1934_v62 = vadd.f32 %v2756_v23, %v4311_v46  ;;  %v2759_v47 = vadd.f32 %v2758_v10, %v2757_v6  ;;  %v2351_v40 = vpop.permute.xlu1 %2350  ;;  %v2356_v61 = vpop.permute.xlu0 %2355 }
 0x26d   :  { %v2871_v7 = vadd.f32 %v2870_v41, %v2869_v52 }
 0x26e   :  { %v2428_v15 = vadd.f32 %v2427_v35, %v2397_v37  ;;  %v2398_v27 = vmul.f32 %v2341_v26, %v2174_v25  ;;  %v1937_v49 = vadd.f32 %v2759_v47, %v4319_v29  ;;  %v2095_v17 = vadd.f32 %v2868_v21, %v1934_v62 }
 0x270   :  { %v2429_v53 = vadd.f32 %v2428_v15, %v2398_v27  ;;  %v2143_v28 = vmul.f32 0.2, %v2095_v17  ;;  %v2098_v16 = vadd.f32 %v2871_v7, %v1937_v49  ;;  %v2760_v19 = vpop.f32.mrb[88].mxu1  ;;  %v2872_v55 = vpop.f32.mrb[88].mxu0 }
 0x271   :  { %v2761_v31 = vpop.f32.mrb[89].mxu1  ;;  %v2873_v13 = vpop.f32.mrb[89].mxu0 }
 0x272   :  { %v2175_v56 = vmax.f32 %v2095_v17, %v2143_v28  ;;  %v2144_v32 = vmul.f32 0.2, %v2098_v16  ;;  %v2762_v33 = vadd.f32 %v2761_v31, %v2760_v19  ;;  %v2763_v46 = vpop.f32.mrb[90].mxu1  ;;  %v2874_v44 = vadd.f32 %v2873_v13, %v2872_v55  ;;  %v2875_v3 = vpop.f32.mrb[90].mxu0 }
 0x273   :  { %v2764_v42 = vpop.f32.mrb[91].mxu1  ;;  %v2876_v57 = vpop.f32.mrb[91].mxu0 }
 0x274   :  { %v2399_v54 = vmul.f32 %v2346_v48, %v2175_v56  ;;  %v2176_v29 = vmax.f32 %v2098_v16, %v2144_v32  ;;  %v1942_v2 = vadd.f32 %v2762_v33, %v4325_v1  ;;  %v2765_v34 = vadd.f32 %v2764_v42, %v2763_v46  ;;  %v2361_v12 = vpop.permute.xlu1 %2360  ;;  %v2366_v7 = vpop.permute.xlu0 %2365 }
 0x275   :  { %v2877_v14 = vadd.f32 %v2876_v57, %v2875_v3 }
 0x276   :  { %v2430_v39 = vadd.f32 %v2429_v53, %v2399_v54  ;;  %v2400_v63 = vmul.f32 %v2351_v40, %v2176_v29  ;;  %v1945_v24 = vadd.f32 %v2765_v34, %v4331_v11  ;;  %v2103_v38 = vadd.f32 %v2874_v44, %v1942_v2 }
 0x277   :  { %v2448_v53 = vlaneseq }
 0x278   :  { %v2431_v50 = vadd.f32 %v2430_v39, %v2400_v63  ;;  %v2145_v43 = vmul.f32 0.2, %v2103_v38  ;;  %v2106_v0 = vadd.f32 %v2877_v14, %v1945_v24  ;;  %v2766_v5 = vpop.f32.mrb[92].mxu1  ;;  %v2878_v45 = vpop.f32.mrb[92].mxu0 }
 0x279   :  { %v2767_v20 = vpop.f32.mrb[93].mxu1  ;;  %v2879_v36 = vpop.f32.mrb[93].mxu0  ;;  %v2449_v16 = vshrl.u32 %v2448_v53, 7 }
 0x27a   :  { %v2177_v51 = vmax.f32 %v2103_v38, %v2145_v43  ;;  %v2146_v26 = vmul.f32 0.2, %v2106_v0  ;;  %v2768_v35 = vadd.f32 %v2767_v20, %v2766_v5  ;;  %v2769_v1 = vpop.f32.mrb[94].mxu1  ;;  %v2880_v58 = vadd.f32 %v2879_v36, %v2878_v45  ;;  %v2881_v9 = vpop.f32.mrb[94].mxu0 }
 0x27b   :  { %v2770_v8 = vpop.f32.mrb[95].mxu1  ;;  %v2882_v22 = vpop.f32.mrb[95].mxu0  ;;  %v2450_v31 = vsub.s32 0, %v2449_v16 }
 0x27c   :  { %v2401_v4 = vmul.f32 %v2356_v61, %v2177_v51  ;;  %v2178_v30 = vmax.f32 %v2106_v0, %v2146_v26  ;;  %v1950_v11 = vadd.f32 %v2768_v35, %v4336_v18  ;;  %v2771_v59 = vadd.f32 %v2770_v8, %v2769_v1  ;;  %v2371_v49 = vpop.permute.xlu1 %2370  ;;  %v2446_v13 = vpop.permute.xlu0 %2445 }
 0x27d   :  { %v2883_v23 = vadd.f32 %v2882_v22, %v2881_v9  ;;  %v2451_v32 = vrot.slane %v2446_v13, %v2450_v31 }
 0x27e   :  { %v2432_v6 = vadd.f32 %v2431_v50, %v2401_v4  ;;  %v2402_v21 = vmul.f32 %v2361_v12, %v2178_v30  ;;  %v1953_v52 = vadd.f32 %v2771_v59, %v1473_v60  ;;  %v2111_v10 = vadd.f32 %v2880_v58, %v1950_v11 }
 0x280   :  { %v2433_v41 = vadd.f32 %v2432_v6, %v2402_v21  ;;  %v2147_v37 = vmul.f32 0.2, %v2111_v10  ;;  %v2114_v25 = vadd.f32 %v2883_v23, %v1953_v52 }
 0x282   :  { %v2179_v62 = vmax.f32 %v2111_v10, %v2147_v37  ;;  %v2148_v47 = vmul.f32 0.2, %v2114_v25 }
 0x284   :  { %v2403_v15 = vmul.f32 %v2366_v7, %v2179_v62  ;;  %v2180_v27 = vmax.f32 %v2114_v25, %v2148_v47 }
 0x286   :  { %v2434_v17 = vadd.f32 %v2433_v41, %v2403_v15  ;;  %v2404_v48 = vmul.f32 %v2371_v49, %v2180_v27 }
 0x288   :  { %v2435_v18 = vadd.f32 %v2434_v17, %v2404_v48 }
 0x28a   :  { %v2436_v28 = vrot.slane %v2435_v18, 4 }
 0x28c   :  { %v2437_v19 = vadd.f32 %v2436_v28, %v2435_v18 }
 0x28e   :  { %v2438_v55 = vrot.slane %v2437_v19, 2 }
 0x290   :  { %v2439_v60 = vadd.f32 %v2438_v55, %v2437_v19 }
 0x292   :  { %v2440_v56 = vrot.slane %v2439_v60, 1 }
 0x294   :  { %v2441_v33 = vadd.f32 %v2440_v56, %v2439_v60 }
 0x296   :  { %v2452_v46 = vadd.f32 %v2451_v32, %v2441_v33 }
 0x298   :  { %v2453_v44 = vand.u32 2147483647, %v2452_v46  ;;  %vm2459_vm1 = vcmp.ge.f32.partialorder %v2452_v46, 0.0 }
 0x29a   :  { %v2454_v3 = vsub.f32 0.0, %v2453_v44 }
 0x29c   :  { %v2455_v42 = vmul.f32 1.442695, %v2454_v3 }
 0x29e   :  { %3084 = vpow2.f32 %v2455_v42 }
 0x2a8   :  { %v3085_v57 = vpop.eup %3084 }
 0x2a9   :  { %v2457_v54 = vadd.f32 1.0, %v3085_v57 }
 0x2ab   :  { %3086 = vrcp.f32 %v2457_v54 }
 0x2b5   :  { %v3087_v29 = vpop.eup %3086 }
 0x2b6   :  { %v2460_v2 = vmul.f32 %v3087_v29, %v3085_v57 }
 0x2b8   :  { %v2461_v34 = vsel %vm2459_vm1, %v3087_v29, %v2460_v2 }
 0x2b9   :  { %2462 = vst [vmem:[%s4353_s7] sm:$0x1] %v2461_v34 }

</bundles_post_ra>
